<compile_context>
chip_gen: v5e
topology: v5e:2x2
jax: 0.10.0
libtpu: 0.0.40
codegen_flags: <defaults>
</compile_context>

<pallas_src>
import jax
import jax.numpy as jnp
from jax.experimental import pallas as pl
from jax.experimental.pallas import tpu as pltpu


def _bilstm_kernel(lens_ref, gf_ref, gb_ref, whh_f_ref, whh_b_ref,
                   wrh_ref, brh_ref, wrc_ref, brc_ref,
                   out_ref, hcat_ref, ccat_ref, newh_ref, newc_ref,
                   hf_s, cf_s, hb_s, cb_s):
    """Grid step s: forward times [s*TS, (s+1)*TS) and backward chunk Tc-1-s
    processed in descending time order."""
    s = pl.program_id(0)
    Tc = pl.num_programs(0)
    TS, B, G = gf_ref.shape          # G = 4*H
    H = G // 4

    @pl.when(s == 0)
    def _():
        hf_s[...] = jnp.zeros_like(hf_s)
        cf_s[...] = jnp.zeros_like(cf_s)
        hb_s[...] = jnp.zeros_like(hb_s)
        cb_s[...] = jnp.zeros_like(cb_s)

    lens = lens_ref[...]                                      # [B, 1] int32

    # Per-lane activation multiplier: 2.0 on the tanh-gate (g) lanes, 1.0 on
    # the sigmoid (i, f, o) lanes.  tanh(x) = 2*sigmoid(2x) - 1, so a single
    # full-tile sigmoid covers all four gates (hoisted out of the step loop).
    lane = jax.lax.broadcasted_iota(jnp.int32, (1, G), 1)
    is_g = jnp.logical_and(lane >= 2 * H, lane < 3 * H)
    gate_mul = jnp.where(is_g, 2.0, 1.0).astype(jnp.float32)  # [1, G]
    gate_off = gate_mul - 1.0                                  # [1, G]

    whh_f = whh_f_ref[...]
    whh_b = whh_b_ref[...]

    def lstm_step(gates_in, h_prev, c_prev, whh, valid):
        # gate order matches PyTorch: i, f, g, o
        gates = gates_in + jnp.dot(h_prev, whh,
                                   preferred_element_type=jnp.float32)
        # one full-tile sigmoid; g lanes become tanh via 2*sigmoid(2x)-1
        act = jax.nn.sigmoid(gates * gate_mul) * gate_mul - gate_off
        i = act[:, 0 * H:1 * H]
        f = act[:, 1 * H:2 * H]
        g = act[:, 2 * H:3 * H]
        o = act[:, 3 * H:4 * H]
        c_new = f * c_prev + i * g
        h_new = o * jnp.tanh(c_new)
        c_out = jnp.where(valid, c_new, c_prev)               # no update on pad
        h_out = jnp.where(valid, h_new, h_prev)
        y = jnp.where(valid, h_new, 0.0)                      # padded output -> 0
        return h_out, c_out, y

    h_f = hf_s[...]; c_f = cf_s[...]
    h_b = hb_s[...]; c_b = cb_s[...]

    t0_f = s * TS                        # first forward time of this chunk
    t0_b = (Tc - 1 - s) * TS             # first time of the backward chunk

    # Static inner loop over the time chunk (fully unrolled; TS is small).
    # TODO(synk): switch to lax.fori_loop at much larger TS/B/H to bound
    # live ranges / code size.
    for k in range(TS):
        valid_f = (t0_f + k) < lens                           # [B, 1] bool
        h_f, c_f, y_f = lstm_step(gf_ref[k], h_f, c_f, whh_f, valid_f)

        kb = TS - 1 - k                                       # reverse within chunk
        valid_b = (t0_b + kb) < lens
        h_b, c_b, y_b = lstm_step(gb_ref[kb], h_b, c_b, whh_b, valid_b)

        # one lane-dense row store; backward half is in processing order
        out_ref[k] = jnp.concatenate([y_f, y_b], axis=-1)

    hf_s[...] = h_f; cf_s[...] = c_f
    hb_s[...] = h_b; cb_s[...] = c_b

    @pl.when(s == Tc - 1)
    def _():
        h_cat = jnp.concatenate([h_f, h_b], axis=-1)          # [B, 2H]
        c_cat = jnp.concatenate([c_f, c_b], axis=-1)
        hcat_ref[...] = h_cat
        ccat_ref[...] = c_cat
        newh_ref[...] = (jnp.dot(h_cat, wrh_ref[...],
                                 preferred_element_type=jnp.float32)
                         + brh_ref[...])
        newc_ref[...] = (jnp.dot(c_cat, wrc_ref[...],
                                 preferred_element_type=jnp.float32)
                         + brc_ref[...])


def rnn_encoder_forward(embedded_words, input_lens, params, *,
                        time_chunk=16, max_len=None):
    """embedded_words: [B, T, D] (batch_first, like PyTorch); input_lens: [B].

    Returns (output [max_len, B, 2H], context_mask [B, max_len],
             (new_h, new_c) each [B, H], (h_, c_) each [B, 2H]).

    `max_len` (= max(input_lens), what pad_packed_sequence trims to) should be
    passed as a static Python int to keep the wrapper jit-able; if None it is
    computed eagerly (forces a device sync).
    """
    B, T, D = embedded_words.shape
    H = params["whh_f"].shape[0]
    f32 = jnp.float32

    lens = input_lens.astype(jnp.int32)
    lens2d = lens[:, None]                                    # [B, 1]

    TS = max(1, min(int(time_chunk), T))
    Tc = -(-T // TS)
    T_pad = Tc * TS

    x = jnp.transpose(embedded_words, (1, 0, 2)).astype(f32)  # [T, B, D]
    if T_pad != T:
        x = jnp.pad(x, ((0, T_pad - T), (0, 0), (0, 0)))      # pad steps masked

    # Hoisted input projection: one big [T*B, D] x [D, 4H] matmul per direction
    # (plain XLA); the MXU-hostile per-step x @ W_ih is gone from the
    # recurrence.
    # TODO(synk): bf16 weights/gates with f32 accumulation at production sizes
    # (kept f32 here for a tight numerical check).
    gates_f = jnp.einsum("tbd,dg->tbg", x, params["wih_f"]) + params["b_f"]
    gates_b = jnp.einsum("tbd,dg->tbg", x, params["wih_b"]) + params["b_b"]

    chunk3 = lambda s: (s, 0, 0)
    rchunk3 = lambda s: (Tc - 1 - s, 0, 0)
    const2 = lambda s: (0, 0)

    grid_spec = pltpu.PrefetchScalarGridSpec(
        num_scalar_prefetch=0,
        grid=(Tc,),
        in_specs=[
            pl.BlockSpec((B, 1), const2),            # input_lens (one tiny DMA)
            pl.BlockSpec((TS, B, 4 * H), chunk3),    # fwd input-gates chunk
            pl.BlockSpec((TS, B, 4 * H), rchunk3),   # bwd input-gates chunk
            pl.BlockSpec((H, 4 * H), const2),        # W_hh fwd (transposed)
            pl.BlockSpec((H, 4 * H), const2),        # W_hh bwd (transposed)
            pl.BlockSpec((2 * H, H), const2),        # reduce_h W^T
            pl.BlockSpec((1, H), const2),            # reduce_h b
            pl.BlockSpec((2 * H, H), const2),        # reduce_c W^T
            pl.BlockSpec((1, H), const2),            # reduce_c b
        ],
        out_specs=[
            pl.BlockSpec((TS, B, 2 * H), chunk3),    # per-step [fwd | bwd(rev)]
            pl.BlockSpec((B, 2 * H), const2),        # h_ = [h_fwd, h_bwd]
            pl.BlockSpec((B, 2 * H), const2),        # c_ = [c_fwd, c_bwd]
            pl.BlockSpec((B, H), const2),            # new_h
            pl.BlockSpec((B, H), const2),            # new_c
        ],
        scratch_shapes=[pltpu.VMEM((B, H), f32)] * 4,   # h_f, c_f, h_b, c_b
    )

    out_shape = (
        jax.ShapeDtypeStruct((T_pad, B, 2 * H), f32),
        jax.ShapeDtypeStruct((B, 2 * H), f32),
        jax.ShapeDtypeStruct((B, 2 * H), f32),
        jax.ShapeDtypeStruct((B, H), f32),
        jax.ShapeDtypeStruct((B, H), f32),
    )

    out_fb, h_, c_, new_h, new_c = pl.pallas_call(
        _bilstm_kernel,
        out_shape=out_shape,
        grid_spec=grid_spec,
        compiler_params=pltpu.CompilerParams(
            dimension_semantics=("arbitrary",)),     # time recurrence is serial
    )(lens2d, gates_f, gates_b,
      params["whh_f"], params["whh_b"],
      params["wrh"], params["brh"], params["wrc"], params["brc"])

    # Glue: assemble the PyTorch-shaped returns.  The flip fuses into the
    # concat's gather in XLA, so this is a single pass over the output.
    if max_len is None:
        max_len = int(jnp.max(lens))                 # eager fallback (syncs)
    out_f = out_fb[:, :, :H]                                  # [T_pad, B, H]
    out_b = jnp.flip(out_fb[:, :, H:], axis=0)                # undo proc order
    output = jnp.concatenate([out_f, out_b], axis=-1)[:max_len]  # [T_max, B, 2H]
    context_mask = (jnp.arange(max_len)[None, :] < lens[:, None]).astype(jnp.int32)
    return output, context_mask, (new_h, new_c), (h_, c_)


def init_params(key, input_emb_dim, hidden_size):
    """Deterministic synthetic parameters matching nn.LSTM / nn.Linear shapes."""
    D, H = input_emb_dim, hidden_size
    k_lstm = 1.0 / float(H) ** 0.5
    k_lin = 1.0 / float(2 * H) ** 0.5
    ks = jax.random.split(key, 12)
    u = lambda kk, shape, s: jax.random.uniform(kk, shape, jnp.float32, -s, s)
    return dict(
        wih_f=u(ks[0], (D, 4 * H), k_lstm),               # weight_ih_l0^T
        whh_f=u(ks[1], (H, 4 * H), k_lstm),               # weight_hh_l0^T
        b_f=u(ks[2], (1, 4 * H), k_lstm) + u(ks[3], (1, 4 * H), k_lstm),
        wih_b=u(ks[4], (D, 4 * H), k_lstm),               # *_reverse
        whh_b=u(ks[5], (H, 4 * H), k_lstm),
        b_b=u(ks[6], (1, 4 * H), k_lstm) + u(ks[7], (1, 4 * H), k_lstm),
        wrh=u(ks[8], (2 * H, H), k_lin),                  # reduce_h_W.weight^T
        brh=u(ks[9], (1, H), k_lin),
        wrc=u(ks[10], (2 * H, H), k_lin),                 # reduce_c_W.weight^T
        brc=u(ks[11], (1, H), k_lin),
    )


def _reference_forward(embedded_words, input_lens, p):
    """Pure-JAX reference of the same semantics, for a correctness check."""
    B, T, D = embedded_words.shape
    H = p["whh_f"].shape[0]
    x = jnp.transpose(embedded_words, (1, 0, 2)).astype(jnp.float32)
    mask = (jnp.arange(T)[:, None] < input_lens[None, :]).astype(jnp.float32)

    def run(wih, whh, b, order):
        h = jnp.zeros((B, H), jnp.float32)
        c = jnp.zeros((B, H), jnp.float32)
        outs = [None] * T
        for t in order:
            g = x[t] @ wih + h @ whh + b
            i = jax.nn.sigmoid(g[:, :H]); f = jax.nn.sigmoid(g[:, H:2 * H])
            gg = jnp.tanh(g[:, 2 * H:3 * H]); o = jax.nn.sigmoid(g[:, 3 * H:])
            cn = f * c + i * gg
            hn = o * jnp.tanh(cn)
            m = mask[t][:, None]
            c = jnp.where(m > 0, cn, c)
            h = jnp.where(m > 0, hn, h)
            outs[t] = hn * m
        return jnp.stack(outs, 0), h, c

    of, hf, cf = run(p["wih_f"], p["whh_f"], p["b_f"], range(T))
    ob, hb, cb = run(p["wih_b"], p["whh_b"], p["b_b"], range(T - 1, -1, -1))
    max_len = int(jnp.max(input_lens))
    output = jnp.concatenate([of, ob], axis=-1)[:max_len]
    h_ = jnp.concatenate([hf, hb], axis=1)
    c_ = jnp.concatenate([cf, cb], axis=1)
    new_h = h_ @ p["wrh"] + p["brh"]
    new_c = c_ @ p["wrc"] + p["brc"]
    return output, (new_h, new_c), (h_, c_)


if __name__ == "__main__":
    def check(B, T, D, H, lens_list, time_chunk, key):
        kx, kp = jax.random.split(key)
        embedded_words = jax.random.normal(kx, (B, T, D), jnp.float32)
        input_lens = jnp.array(lens_list, jnp.int32)
        params = init_params(kp, D, H)
        max_len = max(lens_list)                     # static, jit-friendly

        output, context_mask, (new_h, new_c), (h_, c_) = rnn_encoder_forward(
            embedded_words, input_lens, params,
            time_chunk=time_chunk, max_len=max_len)
        jax.block_until_ready((output, context_mask, new_h, new_c, h_, c_))

        ro, (rnh, rnc), (rh, rc) = _reference_forward(
            embedded_words, input_lens, params)
        assert output.shape == (max_len, B, 2 * H)
        assert context_mask.shape == (B, max_len)
        for a, b_ in ((output, ro), (new_h, rnh), (new_c, rnc),
                      (h_, rh), (c_, rc)):
            assert float(jnp.max(jnp.abs(a - b_))) < 5e-4

    key = jax.random.PRNGKey(0)
    k1, k2 = jax.random.split(key)
    # Case 1: T divisible by the time chunk (single grid step).
    check(B=2, T=8, D=16, H=32, lens_list=[8, 5], time_chunk=8, key=k1)
    # Case 2: ragged T with padding and a multi-chunk grid.
    check(B=2, T=11, D=16, H=32, lens_list=[11, 7], time_chunk=4, key=k2)
    print("KERNEL_OK")
</pallas_src>

<mosaic_0001>
module attributes {stable_mosaic.version = 11 : i64} {
  func.func @_bilstm_kernel(%arg0: i32, %arg1: memref<2x1xi32, #tpu.memory_space<vmem>>, %arg2: memref<8x2x128xf32, #tpu.memory_space<vmem>>, %arg3: memref<8x2x128xf32, #tpu.memory_space<vmem>>, %arg4: memref<32x128xf32, #tpu.memory_space<vmem>>, %arg5: memref<32x128xf32, #tpu.memory_space<vmem>>, %arg6: memref<64x32xf32, #tpu.memory_space<vmem>>, %arg7: memref<1x32xf32, #tpu.memory_space<vmem>>, %arg8: memref<64x32xf32, #tpu.memory_space<vmem>>, %arg9: memref<1x32xf32, #tpu.memory_space<vmem>>, %arg10: memref<8x2x64xf32, #tpu.memory_space<vmem>>, %arg11: memref<2x64xf32, #tpu.memory_space<vmem>>, %arg12: memref<2x64xf32, #tpu.memory_space<vmem>>, %arg13: memref<2x32xf32, #tpu.memory_space<vmem>>, %arg14: memref<2x32xf32, #tpu.memory_space<vmem>>, %arg15: memref<2x32xf32, #tpu.memory_space<vmem>>, %arg16: memref<2x32xf32, #tpu.memory_space<vmem>>, %arg17: memref<2x32xf32, #tpu.memory_space<vmem>>, %arg18: memref<2x32xf32, #tpu.memory_space<vmem>>) attributes {dimension_semantics = [#tpu.dimension_semantics<arbitrary>], iteration_bounds = array<i64: 1>, scalar_prefetch = 0 : i64, scratch_operands = 4 : i64, tpu.core_type = #tpu.core_type<tc>, window_params = [{pipeline_mode = #tpu.pipeline_mode<synchronous>, transform_indices = @transform_0, window_bounds = array<i64: 2, 1>}, {transform_indices = @transform_1, window_bounds = array<i64: 8, 2, 128>}, {transform_indices = @transform_2, window_bounds = array<i64: 8, 2, 128>}, {pipeline_mode = #tpu.pipeline_mode<synchronous>, transform_indices = @transform_3, window_bounds = array<i64: 32, 128>}, {pipeline_mode = #tpu.pipeline_mode<synchronous>, transform_indices = @transform_4, window_bounds = array<i64: 32, 128>}, {pipeline_mode = #tpu.pipeline_mode<synchronous>, transform_indices = @transform_5, window_bounds = array<i64: 64, 32>}, {pipeline_mode = #tpu.pipeline_mode<synchronous>, transform_indices = @transform_6, window_bounds = array<i64: 1, 32>}, {pipeline_mode = #tpu.pipeline_mode<synchronous>, transform_indices = @transform_7, window_bounds = array<i64: 64, 32>}, {pipeline_mode = #tpu.pipeline_mode<synchronous>, transform_indices = @transform_8, window_bounds = array<i64: 1, 32>}, {transform_indices = @transform_9, window_bounds = array<i64: 8, 2, 64>}, {pipeline_mode = #tpu.pipeline_mode<synchronous>, transform_indices = @transform_10, window_bounds = array<i64: 2, 64>}, {pipeline_mode = #tpu.pipeline_mode<synchronous>, transform_indices = @transform_11, window_bounds = array<i64: 2, 64>}, {pipeline_mode = #tpu.pipeline_mode<synchronous>, transform_indices = @transform_12, window_bounds = array<i64: 2, 32>}, {pipeline_mode = #tpu.pipeline_mode<synchronous>, transform_indices = @transform_13, window_bounds = array<i64: 2, 32>}]} {
    %c0_i32 = arith.constant 0 : i32
    %0 = arith.cmpi eq, %arg0, %c0_i32 : i32
    %1 = arith.extui %0 : i1 to i32
    %c0_i32_0 = arith.constant 0 : i32
    %2 = arith.cmpi ne, %1, %c0_i32_0 : i32
    scf.if %2 {
      %cst_150 = arith.constant 0.000000e+00 : f32
      %655 = vector.broadcast %cst_150 : f32 to vector<2x32xf32>
      %c0_151 = arith.constant 0 : index
      %c0_152 = arith.constant 0 : index
      %656 = vector.load %arg15[%c0_151, %c0_152] : memref<2x32xf32, #tpu.memory_space<vmem>>, vector<2x32xf32>
      tpu.vector_store %arg15[%c0_151, %c0_152], %655 {strides = array<i32>} : memref<2x32xf32, #tpu.memory_space<vmem>>, vector<2x32xf32>,
      %cst_153 = arith.constant 0.000000e+00 : f32
      %657 = vector.broadcast %cst_153 : f32 to vector<2x32xf32>
      %c0_154 = arith.constant 0 : index
      %c0_155 = arith.constant 0 : index
      %658 = vector.load %arg16[%c0_154, %c0_155] : memref<2x32xf32, #tpu.memory_space<vmem>>, vector<2x32xf32>
      tpu.vector_store %arg16[%c0_154, %c0_155], %657 {strides = array<i32>} : memref<2x32xf32, #tpu.memory_space<vmem>>, vector<2x32xf32>,
      %cst_156 = arith.constant 0.000000e+00 : f32
      %659 = vector.broadcast %cst_156 : f32 to vector<2x32xf32>
      %c0_157 = arith.constant 0 : index
      %c0_158 = arith.constant 0 : index
      %660 = vector.load %arg17[%c0_157, %c0_158] : memref<2x32xf32, #tpu.memory_space<vmem>>, vector<2x32xf32>
      tpu.vector_store %arg17[%c0_157, %c0_158], %659 {strides = array<i32>} : memref<2x32xf32, #tpu.memory_space<vmem>>, vector<2x32xf32>,
      %cst_159 = arith.constant 0.000000e+00 : f32
      %661 = vector.broadcast %cst_159 : f32 to vector<2x32xf32>
      %c0_160 = arith.constant 0 : index
      %c0_161 = arith.constant 0 : index
      %662 = vector.load %arg18[%c0_160, %c0_161] : memref<2x32xf32, #tpu.memory_space<vmem>>, vector<2x32xf32>
      tpu.vector_store %arg18[%c0_160, %c0_161], %661 {strides = array<i32>} : memref<2x32xf32, #tpu.memory_space<vmem>>, vector<2x32xf32>,
    } else {
    }
    %c0 = arith.constant 0 : index
    %c0_1 = arith.constant 0 : index
    %3 = vector.load %arg1[%c0, %c0_1] : memref<2x1xi32, #tpu.memory_space<vmem>>, vector<2x1xi32>
    %4 = tpu.iota {dimensions = array<i32: 1>} : vector<1x128xi32>
    %c64_i32 = arith.constant 64 : i32
    %5 = vector.broadcast %c64_i32 : i32 to vector<1x128xi32>
    %6 = arith.cmpi sge, %4, %5 : vector<1x128xi32>
    %c96_i32 = arith.constant 96 : i32
    %7 = vector.broadcast %c96_i32 : i32 to vector<1x128xi32>
    %8 = arith.cmpi slt, %4, %7 : vector<1x128xi32>
    %9 = arith.andi %6, %8 : vector<1x128xi1>
    %cst = arith.constant 2.000000e+00 : f32
    %cst_2 = arith.constant 1.000000e+00 : f32
    %10 = vector.broadcast %cst : f32 to vector<1x128xf32>
    %11 = vector.broadcast %cst_2 : f32 to vector<1x128xf32>
    %12 = arith.select %9, %10, %11 : vector<1x128xi1>, vector<1x128xf32>
    %cst_3 = arith.constant 1.000000e+00 : f32
    %13 = vector.broadcast %cst_3 : f32 to vector<1x128xf32>
    %14 = arith.subf %12, %13 : vector<1x128xf32>
    %c0_4 = arith.constant 0 : index
    %c0_5 = arith.constant 0 : index
    %15 = vector.load %arg4[%c0_4, %c0_5] : memref<32x128xf32, #tpu.memory_space<vmem>>, vector<32x128xf32>
    %c0_6 = arith.constant 0 : index
    %c0_7 = arith.constant 0 : index
    %16 = vector.load %arg5[%c0_6, %c0_7] : memref<32x128xf32, #tpu.memory_space<vmem>>, vector<32x128xf32>
    %c0_8 = arith.constant 0 : index
    %c0_9 = arith.constant 0 : index
    %17 = vector.load %arg15[%c0_8, %c0_9] : memref<2x32xf32, #tpu.memory_space<vmem>>, vector<2x32xf32>
    %c0_10 = arith.constant 0 : index
    %c0_11 = arith.constant 0 : index
    %18 = vector.load %arg16[%c0_10, %c0_11] : memref<2x32xf32, #tpu.memory_space<vmem>>, vector<2x32xf32>
    %c0_12 = arith.constant 0 : index
    %c0_13 = arith.constant 0 : index
    %19 = vector.load %arg17[%c0_12, %c0_13] : memref<2x32xf32, #tpu.memory_space<vmem>>, vector<2x32xf32>
    %c0_14 = arith.constant 0 : index
    %c0_15 = arith.constant 0 : index
    %20 = vector.load %arg18[%c0_14, %c0_15] : memref<2x32xf32, #tpu.memory_space<vmem>>, vector<2x32xf32>
    %c8_i32 = arith.constant 8 : i32
    %21 = arith.muli %arg0, %c8_i32 : i32
    %c0_i32_16 = arith.constant 0 : i32
    %22 = arith.subi %c0_i32_16, %arg0 : i32
    %c8_i32_17 = arith.constant 8 : i32
    %23 = arith.muli %22, %c8_i32_17 : i32
    %c0_i32_18 = arith.constant 0 : i32
    %24 = arith.addi %21, %c0_i32_18 : i32
    %25 = vector.broadcast %24 : i32 to vector<2x1xi32>
    %26 = arith.cmpi slt, %25, %3 : vector<2x1xi32>
    %c0_19 = arith.constant 0 : index
    %c0_20 = arith.constant 0 : index
    %c0_21 = arith.constant 0 : index
    %27 = vector.load %arg2[%c0_19, %c0_20, %c0_21] : memref<8x2x128xf32, #tpu.memory_space<vmem>>, vector<1x2x128xf32>
    %28 = vector.shape_cast %27 : vector<1x2x128xf32> to vector<2x128xf32>
    %cst_22 = arith.constant dense<0.000000e+00> : vector<2x128xf32>
    %29 = tpu.matmul %17, %15, %cst_22 {dimension_numbers = #tpu.dot_dimension_numbers<[1], [0], [0], [1], [0, 0, 1, 1], [], []>} : vector<2x32xf32>, vector<32x128xf32>, vector<2x128xf32> -> vector<2x128xf32>
    %30 = arith.addf %28, %29 : vector<2x128xf32>
    %31 = vector.broadcast %12 : vector<1x128xf32> to vector<2x128xf32>
    %32 = arith.mulf %30, %31 : vector<2x128xf32>
    %33 = arith.negf %32 : vector<2x128xf32>
    %34 = math.exp %33 : vector<2x128xf32>
    %cst_23 = arith.constant 1.000000e+00 : f32
    %35 = vector.broadcast %cst_23 : f32 to vector<2x128xf32>
    %36 = arith.addf %35, %34 : vector<2x128xf32>
    %37 = arith.divf %35, %36 : vector<2x128xf32>
    %38 = vector.broadcast %12 : vector<1x128xf32> to vector<2x128xf32>
    %39 = arith.mulf %37, %38 : vector<2x128xf32>
    %40 = vector.broadcast %14 : vector<1x128xf32> to vector<2x128xf32>
    %41 = arith.subf %39, %40 : vector<2x128xf32>
    %42 = vector.extract_strided_slice %41 {offsets = [0, 0], sizes = [2, 32], strides = [1, 1]} : vector<2x128xf32> to vector<2x32xf32>
    %43 = vector.extract_strided_slice %41 {offsets = [0, 32], sizes = [2, 32], strides = [1, 1]} : vector<2x128xf32> to vector<2x32xf32>
    %44 = vector.extract_strided_slice %41 {offsets = [0, 64], sizes = [2, 32], strides = [1, 1]} : vector<2x128xf32> to vector<2x32xf32>
    %45 = vector.extract_strided_slice %41 {offsets = [0, 96], sizes = [2, 32], strides = [1, 1]} : vector<2x128xf32> to vector<2x32xf32>
    %46 = arith.mulf %43, %18 : vector<2x32xf32>
    %47 = arith.mulf %42, %44 : vector<2x32xf32>
    %48 = arith.addf %46, %47 : vector<2x32xf32>
    %49 = math.tanh %48 : vector<2x32xf32>
    %50 = arith.mulf %45, %49 : vector<2x32xf32>
    %51 = vector.shape_cast %26 : vector<2x1xi1> to vector<2x1xi1>
    %52 = vector.broadcast %51 : vector<2x1xi1> to vector<2x32xi1>
    %53 = arith.select %52, %48, %18 : vector<2x32xi1>, vector<2x32xf32>
    %54 = vector.shape_cast %26 : vector<2x1xi1> to vector<2x1xi1>
    %55 = vector.broadcast %54 : vector<2x1xi1> to vector<2x32xi1>
    %56 = arith.select %55, %50, %17 : vector<2x32xi1>, vector<2x32xf32>
    %cst_24 = arith.constant 0.000000e+00 : f32
    %57 = vector.shape_cast %26 : vector<2x1xi1> to vector<2x1xi1>
    %58 = vector.broadcast %57 : vector<2x1xi1> to vector<2x32xi1>
    %59 = vector.broadcast %cst_24 : f32 to vector<2x32xf32>
    %60 = arith.select %58, %50, %59 : vector<2x32xi1>, vector<2x32xf32>
    %c7_i32 = arith.constant 7 : i32
    %61 = arith.addi %23, %c7_i32 : i32
    %62 = vector.broadcast %61 : i32 to vector<2x1xi32>
    %63 = arith.cmpi slt, %62, %3 : vector<2x1xi32>
    %c7 = arith.constant 7 : index
    %c0_25 = arith.constant 0 : index
    %c0_26 = arith.constant 0 : index
    %64 = vector.load %arg3[%c7, %c0_25, %c0_26] : memref<8x2x128xf32, #tpu.memory_space<vmem>>, vector<1x2x128xf32>
    %65 = vector.shape_cast %64 : vector<1x2x128xf32> to vector<2x128xf32>
    %cst_27 = arith.constant dense<0.000000e+00> : vector<2x128xf32>
    %66 = tpu.matmul %19, %16, %cst_27 {dimension_numbers = #tpu.dot_dimension_numbers<[1], [0], [0], [1], [0, 0, 1, 1], [], []>} : vector<2x32xf32>, vector<32x128xf32>, vector<2x128xf32> -> vector<2x128xf32>
    %67 = arith.addf %65, %66 : vector<2x128xf32>
    %68 = vector.broadcast %12 : vector<1x128xf32> to vector<2x128xf32>
    %69 = arith.mulf %67, %68 : vector<2x128xf32>
    %70 = arith.negf %69 : vector<2x128xf32>
    %71 = math.exp %70 : vector<2x128xf32>
    %cst_28 = arith.constant 1.000000e+00 : f32
    %72 = vector.broadcast %cst_28 : f32 to vector<2x128xf32>
    %73 = arith.addf %72, %71 : vector<2x128xf32>
    %74 = arith.divf %72, %73 : vector<2x128xf32>
    %75 = vector.broadcast %12 : vector<1x128xf32> to vector<2x128xf32>
    %76 = arith.mulf %74, %75 : vector<2x128xf32>
    %77 = vector.broadcast %14 : vector<1x128xf32> to vector<2x128xf32>
    %78 = arith.subf %76, %77 : vector<2x128xf32>
    %79 = vector.extract_strided_slice %78 {offsets = [0, 0], sizes = [2, 32], strides = [1, 1]} : vector<2x128xf32> to vector<2x32xf32>
    %80 = vector.extract_strided_slice %78 {offsets = [0, 32], sizes = [2, 32], strides = [1, 1]} : vector<2x128xf32> to vector<2x32xf32>
    %81 = vector.extract_strided_slice %78 {offsets = [0, 64], sizes = [2, 32], strides = [1, 1]} : vector<2x128xf32> to vector<2x32xf32>
    %82 = vector.extract_strided_slice %78 {offsets = [0, 96], sizes = [2, 32], strides = [1, 1]} : vector<2x128xf32> to vector<2x32xf32>
    %83 = arith.mulf %80, %20 : vector<2x32xf32>
    %84 = arith.mulf %79, %81 : vector<2x32xf32>
    %85 = arith.addf %83, %84 : vector<2x32xf32>
    %86 = math.tanh %85 : vector<2x32xf32>
    %87 = arith.mulf %82, %86 : vector<2x32xf32>
    %88 = vector.shape_cast %63 : vector<2x1xi1> to vector<2x1xi1>
    %89 = vector.broadcast %88 : vector<2x1xi1> to vector<2x32xi1>
    %90 = arith.select %89, %85, %20 : vector<2x32xi1>, vector<2x32xf32>
    %91 = vector.shape_cast %63 : vector<2x1xi1> to vector<2x1xi1>
    %92 = vector.broadcast %91 : vector<2x1xi1> to vector<2x32xi1>
    %93 = arith.select %92, %87, %19 : vector<2x32xi1>, vector<2x32xf32>
    %cst_29 = arith.constant 0.000000e+00 : f32
    %94 = vector.shape_cast %63 : vector<2x1xi1> to vector<2x1xi1>
    %95 = vector.broadcast %94 : vector<2x1xi1> to vector<2x32xi1>
    %96 = vector.broadcast %cst_29 : f32 to vector<2x32xf32>
    %97 = arith.select %95, %87, %96 : vector<2x32xi1>, vector<2x32xf32>
    %98 = tpu.concatenate %60, %97 in 1 : vector<2x32xf32>, vector<2x32xf32> -> vector<2x64xf32>
    %c0_30 = arith.constant 0 : index
    %c0_31 = arith.constant 0 : index
    %c0_32 = arith.constant 0 : index
    %99 = vector.load %arg10[%c0_30, %c0_31, %c0_32] : memref<8x2x64xf32, #tpu.memory_space<vmem>>, vector<1x2x64xf32>
    %100 = vector.shape_cast %99 : vector<1x2x64xf32> to vector<2x64xf32>
    %101 = vector.shape_cast %98 : vector<2x64xf32> to vector<1x2x64xf32>
    tpu.vector_store %arg10[%c0_30, %c0_31, %c0_32], %101 {strides = array<i32>} : memref<8x2x64xf32, #tpu.memory_space<vmem>>, vector<1x2x64xf32>,
    %c1_i32 = arith.constant 1 : i32
    %102 = arith.addi %21, %c1_i32 : i32
    %103 = vector.broadcast %102 : i32 to vector<2x1xi32>
    %104 = arith.cmpi slt, %103, %3 : vector<2x1xi32>
    %c1 = arith.constant 1 : index
    %c0_33 = arith.constant 0 : index
    %c0_34 = arith.constant 0 : index
    %105 = vector.load %arg2[%c1, %c0_33, %c0_34] : memref<8x2x128xf32, #tpu.memory_space<vmem>>, vector<1x2x128xf32>
    %106 = vector.shape_cast %105 : vector<1x2x128xf32> to vector<2x128xf32>
    %cst_35 = arith.constant dense<0.000000e+00> : vector<2x128xf32>
    %107 = tpu.matmul %56, %15, %cst_35 {dimension_numbers = #tpu.dot_dimension_numbers<[1], [0], [0], [1], [0, 0, 1, 1], [], []>} : vector<2x32xf32>, vector<32x128xf32>, vector<2x128xf32> -> vector<2x128xf32>
    %108 = arith.addf %106, %107 : vector<2x128xf32>
    %109 = vector.broadcast %12 : vector<1x128xf32> to vector<2x128xf32>
    %110 = arith.mulf %108, %109 : vector<2x128xf32>
    %111 = arith.negf %110 : vector<2x128xf32>
    %112 = math.exp %111 : vector<2x128xf32>
    %cst_36 = arith.constant 1.000000e+00 : f32
    %113 = vector.broadcast %cst_36 : f32 to vector<2x128xf32>
    %114 = arith.addf %113, %112 : vector<2x128xf32>
    %115 = arith.divf %113, %114 : vector<2x128xf32>
    %116 = vector.broadcast %12 : vector<1x128xf32> to vector<2x128xf32>
    %117 = arith.mulf %115, %116 : vector<2x128xf32>
    %118 = vector.broadcast %14 : vector<1x128xf32> to vector<2x128xf32>
    %119 = arith.subf %117, %118 : vector<2x128xf32>
    %120 = vector.extract_strided_slice %119 {offsets = [0, 0], sizes = [2, 32], strides = [1, 1]} : vector<2x128xf32> to vector<2x32xf32>
    %121 = vector.extract_strided_slice %119 {offsets = [0, 32], sizes = [2, 32], strides = [1, 1]} : vector<2x128xf32> to vector<2x32xf32>
    %122 = vector.extract_strided_slice %119 {offsets = [0, 64], sizes = [2, 32], strides = [1, 1]} : vector<2x128xf32> to vector<2x32xf32>
    %123 = vector.extract_strided_slice %119 {offsets = [0, 96], sizes = [2, 32], strides = [1, 1]} : vector<2x128xf32> to vector<2x32xf32>
    %124 = arith.mulf %121, %53 : vector<2x32xf32>
    %125 = arith.mulf %120, %122 : vector<2x32xf32>
    %126 = arith.addf %124, %125 : vector<2x32xf32>
    %127 = math.tanh %126 : vector<2x32xf32>
    %128 = arith.mulf %123, %127 : vector<2x32xf32>
    %129 = vector.shape_cast %104 : vector<2x1xi1> to vector<2x1xi1>
    %130 = vector.broadcast %129 : vector<2x1xi1> to vector<2x32xi1>
    %131 = arith.select %130, %126, %53 : vector<2x32xi1>, vector<2x32xf32>
    %132 = vector.shape_cast %104 : vector<2x1xi1> to vector<2x1xi1>
    %133 = vector.broadcast %132 : vector<2x1xi1> to vector<2x32xi1>
    %134 = arith.select %133, %128, %56 : vector<2x32xi1>, vector<2x32xf32>
    %cst_37 = arith.constant 0.000000e+00 : f32
    %135 = vector.shape_cast %104 : vector<2x1xi1> to vector<2x1xi1>
    %136 = vector.broadcast %135 : vector<2x1xi1> to vector<2x32xi1>
    %137 = vector.broadcast %cst_37 : f32 to vector<2x32xf32>
    %138 = arith.select %136, %128, %137 : vector<2x32xi1>, vector<2x32xf32>
    %c6_i32 = arith.constant 6 : i32
    %139 = arith.addi %23, %c6_i32 : i32
    %140 = vector.broadcast %139 : i32 to vector<2x1xi32>
    %141 = arith.cmpi slt, %140, %3 : vector<2x1xi32>
    %c6 = arith.constant 6 : index
    %c0_38 = arith.constant 0 : index
    %c0_39 = arith.constant 0 : index
    %142 = vector.load %arg3[%c6, %c0_38, %c0_39] : memref<8x2x128xf32, #tpu.memory_space<vmem>>, vector<1x2x128xf32>
    %143 = vector.shape_cast %142 : vector<1x2x128xf32> to vector<2x128xf32>
    %cst_40 = arith.constant dense<0.000000e+00> : vector<2x128xf32>
    %144 = tpu.matmul %93, %16, %cst_40 {dimension_numbers = #tpu.dot_dimension_numbers<[1], [0], [0], [1], [0, 0, 1, 1], [], []>} : vector<2x32xf32>, vector<32x128xf32>, vector<2x128xf32> -> vector<2x128xf32>
    %145 = arith.addf %143, %144 : vector<2x128xf32>
    %146 = vector.broadcast %12 : vector<1x128xf32> to vector<2x128xf32>
    %147 = arith.mulf %145, %146 : vector<2x128xf32>
    %148 = arith.negf %147 : vector<2x128xf32>
    %149 = math.exp %148 : vector<2x128xf32>
    %cst_41 = arith.constant 1.000000e+00 : f32
    %150 = vector.broadcast %cst_41 : f32 to vector<2x128xf32>
    %151 = arith.addf %150, %149 : vector<2x128xf32>
    %152 = arith.divf %150, %151 : vector<2x128xf32>
    %153 = vector.broadcast %12 : vector<1x128xf32> to vector<2x128xf32>
    %154 = arith.mulf %152, %153 : vector<2x128xf32>
    %155 = vector.broadcast %14 : vector<1x128xf32> to vector<2x128xf32>
    %156 = arith.subf %154, %155 : vector<2x128xf32>
    %157 = vector.extract_strided_slice %156 {offsets = [0, 0], sizes = [2, 32], strides = [1, 1]} : vector<2x128xf32> to vector<2x32xf32>
    %158 = vector.extract_strided_slice %156 {offsets = [0, 32], sizes = [2, 32], strides = [1, 1]} : vector<2x128xf32> to vector<2x32xf32>
    %159 = vector.extract_strided_slice %156 {offsets = [0, 64], sizes = [2, 32], strides = [1, 1]} : vector<2x128xf32> to vector<2x32xf32>
    %160 = vector.extract_strided_slice %156 {offsets = [0, 96], sizes = [2, 32], strides = [1, 1]} : vector<2x128xf32> to vector<2x32xf32>
    %161 = arith.mulf %158, %90 : vector<2x32xf32>
    %162 = arith.mulf %157, %159 : vector<2x32xf32>
    %163 = arith.addf %161, %162 : vector<2x32xf32>
    %164 = math.tanh %163 : vector<2x32xf32>
    %165 = arith.mulf %160, %164 : vector<2x32xf32>
    %166 = vector.shape_cast %141 : vector<2x1xi1> to vector<2x1xi1>
    %167 = vector.broadcast %166 : vector<2x1xi1> to vector<2x32xi1>
    %168 = arith.select %167, %163, %90 : vector<2x32xi1>, vector<2x32xf32>
    %169 = vector.shape_cast %141 : vector<2x1xi1> to vector<2x1xi1>
    %170 = vector.broadcast %169 : vector<2x1xi1> to vector<2x32xi1>
    %171 = arith.select %170, %165, %93 : vector<2x32xi1>, vector<2x32xf32>
    %cst_42 = arith.constant 0.000000e+00 : f32
    %172 = vector.shape_cast %141 : vector<2x1xi1> to vector<2x1xi1>
    %173 = vector.broadcast %172 : vector<2x1xi1> to vector<2x32xi1>
    %174 = vector.broadcast %cst_42 : f32 to vector<2x32xf32>
    %175 = arith.select %173, %165, %174 : vector<2x32xi1>, vector<2x32xf32>
    %176 = tpu.concatenate %138, %175 in 1 : vector<2x32xf32>, vector<2x32xf32> -> vector<2x64xf32>
    %c1_43 = arith.constant 1 : index
    %c0_44 = arith.constant 0 : index
    %c0_45 = arith.constant 0 : index
    %177 = vector.load %arg10[%c1_43, %c0_44, %c0_45] : memref<8x2x64xf32, #tpu.memory_space<vmem>>, vector<1x2x64xf32>
    %178 = vector.shape_cast %177 : vector<1x2x64xf32> to vector<2x64xf32>
    %179 = vector.shape_cast %176 : vector<2x64xf32> to vector<1x2x64xf32>
    tpu.vector_store %arg10[%c1_43, %c0_44, %c0_45], %179 {strides = array<i32>} : memref<8x2x64xf32, #tpu.memory_space<vmem>>, vector<1x2x64xf32>,
    %c2_i32 = arith.constant 2 : i32
    %180 = arith.addi %21, %c2_i32 : i32
    %181 = vector.broadcast %180 : i32 to vector<2x1xi32>
    %182 = arith.cmpi slt, %181, %3 : vector<2x1xi32>
    %c2 = arith.constant 2 : index
    %c0_46 = arith.constant 0 : index
    %c0_47 = arith.constant 0 : index
    %183 = vector.load %arg2[%c2, %c0_46, %c0_47] : memref<8x2x128xf32, #tpu.memory_space<vmem>>, vector<1x2x128xf32>
    %184 = vector.shape_cast %183 : vector<1x2x128xf32> to vector<2x128xf32>
    %cst_48 = arith.constant dense<0.000000e+00> : vector<2x128xf32>
    %185 = tpu.matmul %134, %15, %cst_48 {dimension_numbers = #tpu.dot_dimension_numbers<[1], [0], [0], [1], [0, 0, 1, 1], [], []>} : vector<2x32xf32>, vector<32x128xf32>, vector<2x128xf32> -> vector<2x128xf32>
    %186 = arith.addf %184, %185 : vector<2x128xf32>
    %187 = vector.broadcast %12 : vector<1x128xf32> to vector<2x128xf32>
    %188 = arith.mulf %186, %187 : vector<2x128xf32>
    %189 = arith.negf %188 : vector<2x128xf32>
    %190 = math.exp %189 : vector<2x128xf32>
    %cst_49 = arith.constant 1.000000e+00 : f32
    %191 = vector.broadcast %cst_49 : f32 to vector<2x128xf32>
    %192 = arith.addf %191, %190 : vector<2x128xf32>
    %193 = arith.divf %191, %192 : vector<2x128xf32>
    %194 = vector.broadcast %12 : vector<1x128xf32> to vector<2x128xf32>
    %195 = arith.mulf %193, %194 : vector<2x128xf32>
    %196 = vector.broadcast %14 : vector<1x128xf32> to vector<2x128xf32>
    %197 = arith.subf %195, %196 : vector<2x128xf32>
    %198 = vector.extract_strided_slice %197 {offsets = [0, 0], sizes = [2, 32], strides = [1, 1]} : vector<2x128xf32> to vector<2x32xf32>
    %199 = vector.extract_strided_slice %197 {offsets = [0, 32], sizes = [2, 32], strides = [1, 1]} : vector<2x128xf32> to vector<2x32xf32>
    %200 = vector.extract_strided_slice %197 {offsets = [0, 64], sizes = [2, 32], strides = [1, 1]} : vector<2x128xf32> to vector<2x32xf32>
    %201 = vector.extract_strided_slice %197 {offsets = [0, 96], sizes = [2, 32], strides = [1, 1]} : vector<2x128xf32> to vector<2x32xf32>
    %202 = arith.mulf %199, %131 : vector<2x32xf32>
    %203 = arith.mulf %198, %200 : vector<2x32xf32>
    %204 = arith.addf %202, %203 : vector<2x32xf32>
    %205 = math.tanh %204 : vector<2x32xf32>
    %206 = arith.mulf %201, %205 : vector<2x32xf32>
    %207 = vector.shape_cast %182 : vector<2x1xi1> to vector<2x1xi1>
    %208 = vector.broadcast %207 : vector<2x1xi1> to vector<2x32xi1>
    %209 = arith.select %208, %204, %131 : vector<2x32xi1>, vector<2x32xf32>
    %210 = vector.shape_cast %182 : vector<2x1xi1> to vector<2x1xi1>
    %211 = vector.broadcast %210 : vector<2x1xi1> to vector<2x32xi1>
    %212 = arith.select %211, %206, %134 : vector<2x32xi1>, vector<2x32xf32>
    %cst_50 = arith.constant 0.000000e+00 : f32
    %213 = vector.shape_cast %182 : vector<2x1xi1> to vector<2x1xi1>
    %214 = vector.broadcast %213 : vector<2x1xi1> to vector<2x32xi1>
    %215 = vector.broadcast %cst_50 : f32 to vector<2x32xf32>
    %216 = arith.select %214, %206, %215 : vector<2x32xi1>, vector<2x32xf32>
    %c5_i32 = arith.constant 5 : i32
    %217 = arith.addi %23, %c5_i32 : i32
    %218 = vector.broadcast %217 : i32 to vector<2x1xi32>
    %219 = arith.cmpi slt, %218, %3 : vector<2x1xi32>
    %c5 = arith.constant 5 : index
    %c0_51 = arith.constant 0 : index
    %c0_52 = arith.constant 0 : index
    %220 = vector.load %arg3[%c5, %c0_51, %c0_52] : memref<8x2x128xf32, #tpu.memory_space<vmem>>, vector<1x2x128xf32>
    %221 = vector.shape_cast %220 : vector<1x2x128xf32> to vector<2x128xf32>
    %cst_53 = arith.constant dense<0.000000e+00> : vector<2x128xf32>
    %222 = tpu.matmul %171, %16, %cst_53 {dimension_numbers = #tpu.dot_dimension_numbers<[1], [0], [0], [1], [0, 0, 1, 1], [], []>} : vector<2x32xf32>, vector<32x128xf32>, vector<2x128xf32> -> vector<2x128xf32>
    %223 = arith.addf %221, %222 : vector<2x128xf32>
    %224 = vector.broadcast %12 : vector<1x128xf32> to vector<2x128xf32>
    %225 = arith.mulf %223, %224 : vector<2x128xf32>
    %226 = arith.negf %225 : vector<2x128xf32>
    %227 = math.exp %226 : vector<2x128xf32>
    %cst_54 = arith.constant 1.000000e+00 : f32
    %228 = vector.broadcast %cst_54 : f32 to vector<2x128xf32>
    %229 = arith.addf %228, %227 : vector<2x128xf32>
    %230 = arith.divf %228, %229 : vector<2x128xf32>
    %231 = vector.broadcast %12 : vector<1x128xf32> to vector<2x128xf32>
    %232 = arith.mulf %230, %231 : vector<2x128xf32>
    %233 = vector.broadcast %14 : vector<1x128xf32> to vector<2x128xf32>
    %234 = arith.subf %232, %233 : vector<2x128xf32>
    %235 = vector.extract_strided_slice %234 {offsets = [0, 0], sizes = [2, 32], strides = [1, 1]} : vector<2x128xf32> to vector<2x32xf32>
    %236 = vector.extract_strided_slice %234 {offsets = [0, 32], sizes = [2, 32], strides = [1, 1]} : vector<2x128xf32> to vector<2x32xf32>
    %237 = vector.extract_strided_slice %234 {offsets = [0, 64], sizes = [2, 32], strides = [1, 1]} : vector<2x128xf32> to vector<2x32xf32>
    %238 = vector.extract_strided_slice %234 {offsets = [0, 96], sizes = [2, 32], strides = [1, 1]} : vector<2x128xf32> to vector<2x32xf32>
    %239 = arith.mulf %236, %168 : vector<2x32xf32>
    %240 = arith.mulf %235, %237 : vector<2x32xf32>
    %241 = arith.addf %239, %240 : vector<2x32xf32>
    %242 = math.tanh %241 : vector<2x32xf32>
    %243 = arith.mulf %238, %242 : vector<2x32xf32>
    %244 = vector.shape_cast %219 : vector<2x1xi1> to vector<2x1xi1>
    %245 = vector.broadcast %244 : vector<2x1xi1> to vector<2x32xi1>
    %246 = arith.select %245, %241, %168 : vector<2x32xi1>, vector<2x32xf32>
    %247 = vector.shape_cast %219 : vector<2x1xi1> to vector<2x1xi1>
    %248 = vector.broadcast %247 : vector<2x1xi1> to vector<2x32xi1>
    %249 = arith.select %248, %243, %171 : vector<2x32xi1>, vector<2x32xf32>
    %cst_55 = arith.constant 0.000000e+00 : f32
    %250 = vector.shape_cast %219 : vector<2x1xi1> to vector<2x1xi1>
    %251 = vector.broadcast %250 : vector<2x1xi1> to vector<2x32xi1>
    %252 = vector.broadcast %cst_55 : f32 to vector<2x32xf32>
    %253 = arith.select %251, %243, %252 : vector<2x32xi1>, vector<2x32xf32>
    %254 = tpu.concatenate %216, %253 in 1 : vector<2x32xf32>, vector<2x32xf32> -> vector<2x64xf32>
    %c2_56 = arith.constant 2 : index
    %c0_57 = arith.constant 0 : index
    %c0_58 = arith.constant 0 : index
    %255 = vector.load %arg10[%c2_56, %c0_57, %c0_58] : memref<8x2x64xf32, #tpu.memory_space<vmem>>, vector<1x2x64xf32>
    %256 = vector.shape_cast %255 : vector<1x2x64xf32> to vector<2x64xf32>
    %257 = vector.shape_cast %254 : vector<2x64xf32> to vector<1x2x64xf32>
    tpu.vector_store %arg10[%c2_56, %c0_57, %c0_58], %257 {strides = array<i32>} : memref<8x2x64xf32, #tpu.memory_space<vmem>>, vector<1x2x64xf32>,
    %c3_i32 = arith.constant 3 : i32
    %258 = arith.addi %21, %c3_i32 : i32
    %259 = vector.broadcast %258 : i32 to vector<2x1xi32>
    %260 = arith.cmpi slt, %259, %3 : vector<2x1xi32>
    %c3 = arith.constant 3 : index
    %c0_59 = arith.constant 0 : index
    %c0_60 = arith.constant 0 : index
    %261 = vector.load %arg2[%c3, %c0_59, %c0_60] : memref<8x2x128xf32, #tpu.memory_space<vmem>>, vector<1x2x128xf32>
    %262 = vector.shape_cast %261 : vector<1x2x128xf32> to vector<2x128xf32>
    %cst_61 = arith.constant dense<0.000000e+00> : vector<2x128xf32>
    %263 = tpu.matmul %212, %15, %cst_61 {dimension_numbers = #tpu.dot_dimension_numbers<[1], [0], [0], [1], [0, 0, 1, 1], [], []>} : vector<2x32xf32>, vector<32x128xf32>, vector<2x128xf32> -> vector<2x128xf32>
    %264 = arith.addf %262, %263 : vector<2x128xf32>
    %265 = vector.broadcast %12 : vector<1x128xf32> to vector<2x128xf32>
    %266 = arith.mulf %264, %265 : vector<2x128xf32>
    %267 = arith.negf %266 : vector<2x128xf32>
    %268 = math.exp %267 : vector<2x128xf32>
    %cst_62 = arith.constant 1.000000e+00 : f32
    %269 = vector.broadcast %cst_62 : f32 to vector<2x128xf32>
    %270 = arith.addf %269, %268 : vector<2x128xf32>
    %271 = arith.divf %269, %270 : vector<2x128xf32>
    %272 = vector.broadcast %12 : vector<1x128xf32> to vector<2x128xf32>
    %273 = arith.mulf %271, %272 : vector<2x128xf32>
    %274 = vector.broadcast %14 : vector<1x128xf32> to vector<2x128xf32>
    %275 = arith.subf %273, %274 : vector<2x128xf32>
    %276 = vector.extract_strided_slice %275 {offsets = [0, 0], sizes = [2, 32], strides = [1, 1]} : vector<2x128xf32> to vector<2x32xf32>
    %277 = vector.extract_strided_slice %275 {offsets = [0, 32], sizes = [2, 32], strides = [1, 1]} : vector<2x128xf32> to vector<2x32xf32>
    %278 = vector.extract_strided_slice %275 {offsets = [0, 64], sizes = [2, 32], strides = [1, 1]} : vector<2x128xf32> to vector<2x32xf32>
    %279 = vector.extract_strided_slice %275 {offsets = [0, 96], sizes = [2, 32], strides = [1, 1]} : vector<2x128xf32> to vector<2x32xf32>
    %280 = arith.mulf %277, %209 : vector<2x32xf32>
    %281 = arith.mulf %276, %278 : vector<2x32xf32>
    %282 = arith.addf %280, %281 : vector<2x32xf32>
    %283 = math.tanh %282 : vector<2x32xf32>
    %284 = arith.mulf %279, %283 : vector<2x32xf32>
    %285 = vector.shape_cast %260 : vector<2x1xi1> to vector<2x1xi1>
    %286 = vector.broadcast %285 : vector<2x1xi1> to vector<2x32xi1>
    %287 = arith.select %286, %282, %209 : vector<2x32xi1>, vector<2x32xf32>
    %288 = vector.shape_cast %260 : vector<2x1xi1> to vector<2x1xi1>
    %289 = vector.broadcast %288 : vector<2x1xi1> to vector<2x32xi1>
    %290 = arith.select %289, %284, %212 : vector<2x32xi1>, vector<2x32xf32>
    %cst_63 = arith.constant 0.000000e+00 : f32
    %291 = vector.shape_cast %260 : vector<2x1xi1> to vector<2x1xi1>
    %292 = vector.broadcast %291 : vector<2x1xi1> to vector<2x32xi1>
    %293 = vector.broadcast %cst_63 : f32 to vector<2x32xf32>
    %294 = arith.select %292, %284, %293 : vector<2x32xi1>, vector<2x32xf32>
    %c4_i32 = arith.constant 4 : i32
    %295 = arith.addi %23, %c4_i32 : i32
    %296 = vector.broadcast %295 : i32 to vector<2x1xi32>
    %297 = arith.cmpi slt, %296, %3 : vector<2x1xi32>
    %c4 = arith.constant 4 : index
    %c0_64 = arith.constant 0 : index
    %c0_65 = arith.constant 0 : index
    %298 = vector.load %arg3[%c4, %c0_64, %c0_65] : memref<8x2x128xf32, #tpu.memory_space<vmem>>, vector<1x2x128xf32>
    %299 = vector.shape_cast %298 : vector<1x2x128xf32> to vector<2x128xf32>
    %cst_66 = arith.constant dense<0.000000e+00> : vector<2x128xf32>
    %300 = tpu.matmul %249, %16, %cst_66 {dimension_numbers = #tpu.dot_dimension_numbers<[1], [0], [0], [1], [0, 0, 1, 1], [], []>} : vector<2x32xf32>, vector<32x128xf32>, vector<2x128xf32> -> vector<2x128xf32>
    %301 = arith.addf %299, %300 : vector<2x128xf32>
    %302 = vector.broadcast %12 : vector<1x128xf32> to vector<2x128xf32>
    %303 = arith.mulf %301, %302 : vector<2x128xf32>
    %304 = arith.negf %303 : vector<2x128xf32>
    %305 = math.exp %304 : vector<2x128xf32>
    %cst_67 = arith.constant 1.000000e+00 : f32
    %306 = vector.broadcast %cst_67 : f32 to vector<2x128xf32>
    %307 = arith.addf %306, %305 : vector<2x128xf32>
    %308 = arith.divf %306, %307 : vector<2x128xf32>
    %309 = vector.broadcast %12 : vector<1x128xf32> to vector<2x128xf32>
    %310 = arith.mulf %308, %309 : vector<2x128xf32>
    %311 = vector.broadcast %14 : vector<1x128xf32> to vector<2x128xf32>
    %312 = arith.subf %310, %311 : vector<2x128xf32>
    %313 = vector.extract_strided_slice %312 {offsets = [0, 0], sizes = [2, 32], strides = [1, 1]} : vector<2x128xf32> to vector<2x32xf32>
    %314 = vector.extract_strided_slice %312 {offsets = [0, 32], sizes = [2, 32], strides = [1, 1]} : vector<2x128xf32> to vector<2x32xf32>
    %315 = vector.extract_strided_slice %312 {offsets = [0, 64], sizes = [2, 32], strides = [1, 1]} : vector<2x128xf32> to vector<2x32xf32>
    %316 = vector.extract_strided_slice %312 {offsets = [0, 96], sizes = [2, 32], strides = [1, 1]} : vector<2x128xf32> to vector<2x32xf32>
    %317 = arith.mulf %314, %246 : vector<2x32xf32>
    %318 = arith.mulf %313, %315 : vector<2x32xf32>
    %319 = arith.addf %317, %318 : vector<2x32xf32>
    %320 = math.tanh %319 : vector<2x32xf32>
    %321 = arith.mulf %316, %320 : vector<2x32xf32>
    %322 = vector.shape_cast %297 : vector<2x1xi1> to vector<2x1xi1>
    %323 = vector.broadcast %322 : vector<2x1xi1> to vector<2x32xi1>
    %324 = arith.select %323, %319, %246 : vector<2x32xi1>, vector<2x32xf32>
    %325 = vector.shape_cast %297 : vector<2x1xi1> to vector<2x1xi1>
    %326 = vector.broadcast %325 : vector<2x1xi1> to vector<2x32xi1>
    %327 = arith.select %326, %321, %249 : vector<2x32xi1>, vector<2x32xf32>
    %cst_68 = arith.constant 0.000000e+00 : f32
    %328 = vector.shape_cast %297 : vector<2x1xi1> to vector<2x1xi1>
    %329 = vector.broadcast %328 : vector<2x1xi1> to vector<2x32xi1>
    %330 = vector.broadcast %cst_68 : f32 to vector<2x32xf32>
    %331 = arith.select %329, %321, %330 : vector<2x32xi1>, vector<2x32xf32>
    %332 = tpu.concatenate %294, %331 in 1 : vector<2x32xf32>, vector<2x32xf32> -> vector<2x64xf32>
    %c3_69 = arith.constant 3 : index
    %c0_70 = arith.constant 0 : index
    %c0_71 = arith.constant 0 : index
    %333 = vector.load %arg10[%c3_69, %c0_70, %c0_71] : memref<8x2x64xf32, #tpu.memory_space<vmem>>, vector<1x2x64xf32>
    %334 = vector.shape_cast %333 : vector<1x2x64xf32> to vector<2x64xf32>
    %335 = vector.shape_cast %332 : vector<2x64xf32> to vector<1x2x64xf32>
    tpu.vector_store %arg10[%c3_69, %c0_70, %c0_71], %335 {strides = array<i32>} : memref<8x2x64xf32, #tpu.memory_space<vmem>>, vector<1x2x64xf32>,
    %c4_i32_72 = arith.constant 4 : i32
    %336 = arith.addi %21, %c4_i32_72 : i32
    %337 = vector.broadcast %336 : i32 to vector<2x1xi32>
    %338 = arith.cmpi slt, %337, %3 : vector<2x1xi32>
    %c4_73 = arith.constant 4 : index
    %c0_74 = arith.constant 0 : index
    %c0_75 = arith.constant 0 : index
    %339 = vector.load %arg2[%c4_73, %c0_74, %c0_75] : memref<8x2x128xf32, #tpu.memory_space<vmem>>, vector<1x2x128xf32>
    %340 = vector.shape_cast %339 : vector<1x2x128xf32> to vector<2x128xf32>
    %cst_76 = arith.constant dense<0.000000e+00> : vector<2x128xf32>
    %341 = tpu.matmul %290, %15, %cst_76 {dimension_numbers = #tpu.dot_dimension_numbers<[1], [0], [0], [1], [0, 0, 1, 1], [], []>} : vector<2x32xf32>, vector<32x128xf32>, vector<2x128xf32> -> vector<2x128xf32>
    %342 = arith.addf %340, %341 : vector<2x128xf32>
    %343 = vector.broadcast %12 : vector<1x128xf32> to vector<2x128xf32>
    %344 = arith.mulf %342, %343 : vector<2x128xf32>
    %345 = arith.negf %344 : vector<2x128xf32>
    %346 = math.exp %345 : vector<2x128xf32>
    %cst_77 = arith.constant 1.000000e+00 : f32
    %347 = vector.broadcast %cst_77 : f32 to vector<2x128xf32>
    %348 = arith.addf %347, %346 : vector<2x128xf32>
    %349 = arith.divf %347, %348 : vector<2x128xf32>
    %350 = vector.broadcast %12 : vector<1x128xf32> to vector<2x128xf32>
    %351 = arith.mulf %349, %350 : vector<2x128xf32>
    %352 = vector.broadcast %14 : vector<1x128xf32> to vector<2x128xf32>
    %353 = arith.subf %351, %352 : vector<2x128xf32>
    %354 = vector.extract_strided_slice %353 {offsets = [0, 0], sizes = [2, 32], strides = [1, 1]} : vector<2x128xf32> to vector<2x32xf32>
    %355 = vector.extract_strided_slice %353 {offsets = [0, 32], sizes = [2, 32], strides = [1, 1]} : vector<2x128xf32> to vector<2x32xf32>
    %356 = vector.extract_strided_slice %353 {offsets = [0, 64], sizes = [2, 32], strides = [1, 1]} : vector<2x128xf32> to vector<2x32xf32>
    %357 = vector.extract_strided_slice %353 {offsets = [0, 96], sizes = [2, 32], strides = [1, 1]} : vector<2x128xf32> to vector<2x32xf32>
    %358 = arith.mulf %355, %287 : vector<2x32xf32>
    %359 = arith.mulf %354, %356 : vector<2x32xf32>
    %360 = arith.addf %358, %359 : vector<2x32xf32>
    %361 = math.tanh %360 : vector<2x32xf32>
    %362 = arith.mulf %357, %361 : vector<2x32xf32>
    %363 = vector.shape_cast %338 : vector<2x1xi1> to vector<2x1xi1>
    %364 = vector.broadcast %363 : vector<2x1xi1> to vector<2x32xi1>
    %365 = arith.select %364, %360, %287 : vector<2x32xi1>, vector<2x32xf32>
    %366 = vector.shape_cast %338 : vector<2x1xi1> to vector<2x1xi1>
    %367 = vector.broadcast %366 : vector<2x1xi1> to vector<2x32xi1>
    %368 = arith.select %367, %362, %290 : vector<2x32xi1>, vector<2x32xf32>
    %cst_78 = arith.constant 0.000000e+00 : f32
    %369 = vector.shape_cast %338 : vector<2x1xi1> to vector<2x1xi1>
    %370 = vector.broadcast %369 : vector<2x1xi1> to vector<2x32xi1>
    %371 = vector.broadcast %cst_78 : f32 to vector<2x32xf32>
    %372 = arith.select %370, %362, %371 : vector<2x32xi1>, vector<2x32xf32>
    %c3_i32_79 = arith.constant 3 : i32
    %373 = arith.addi %23, %c3_i32_79 : i32
    %374 = vector.broadcast %373 : i32 to vector<2x1xi32>
    %375 = arith.cmpi slt, %374, %3 : vector<2x1xi32>
    %c3_80 = arith.constant 3 : index
    %c0_81 = arith.constant 0 : index
    %c0_82 = arith.constant 0 : index
    %376 = vector.load %arg3[%c3_80, %c0_81, %c0_82] : memref<8x2x128xf32, #tpu.memory_space<vmem>>, vector<1x2x128xf32>
    %377 = vector.shape_cast %376 : vector<1x2x128xf32> to vector<2x128xf32>
    %cst_83 = arith.constant dense<0.000000e+00> : vector<2x128xf32>
    %378 = tpu.matmul %327, %16, %cst_83 {dimension_numbers = #tpu.dot_dimension_numbers<[1], [0], [0], [1], [0, 0, 1, 1], [], []>} : vector<2x32xf32>, vector<32x128xf32>, vector<2x128xf32> -> vector<2x128xf32>
    %379 = arith.addf %377, %378 : vector<2x128xf32>
    %380 = vector.broadcast %12 : vector<1x128xf32> to vector<2x128xf32>
    %381 = arith.mulf %379, %380 : vector<2x128xf32>
    %382 = arith.negf %381 : vector<2x128xf32>
    %383 = math.exp %382 : vector<2x128xf32>
    %cst_84 = arith.constant 1.000000e+00 : f32
    %384 = vector.broadcast %cst_84 : f32 to vector<2x128xf32>
    %385 = arith.addf %384, %383 : vector<2x128xf32>
    %386 = arith.divf %384, %385 : vector<2x128xf32>
    %387 = vector.broadcast %12 : vector<1x128xf32> to vector<2x128xf32>
    %388 = arith.mulf %386, %387 : vector<2x128xf32>
    %389 = vector.broadcast %14 : vector<1x128xf32> to vector<2x128xf32>
    %390 = arith.subf %388, %389 : vector<2x128xf32>
    %391 = vector.extract_strided_slice %390 {offsets = [0, 0], sizes = [2, 32], strides = [1, 1]} : vector<2x128xf32> to vector<2x32xf32>
    %392 = vector.extract_strided_slice %390 {offsets = [0, 32], sizes = [2, 32], strides = [1, 1]} : vector<2x128xf32> to vector<2x32xf32>
    %393 = vector.extract_strided_slice %390 {offsets = [0, 64], sizes = [2, 32], strides = [1, 1]} : vector<2x128xf32> to vector<2x32xf32>
    %394 = vector.extract_strided_slice %390 {offsets = [0, 96], sizes = [2, 32], strides = [1, 1]} : vector<2x128xf32> to vector<2x32xf32>
    %395 = arith.mulf %392, %324 : vector<2x32xf32>
    %396 = arith.mulf %391, %393 : vector<2x32xf32>
    %397 = arith.addf %395, %396 : vector<2x32xf32>
    %398 = math.tanh %397 : vector<2x32xf32>
    %399 = arith.mulf %394, %398 : vector<2x32xf32>
    %400 = vector.shape_cast %375 : vector<2x1xi1> to vector<2x1xi1>
    %401 = vector.broadcast %400 : vector<2x1xi1> to vector<2x32xi1>
    %402 = arith.select %401, %397, %324 : vector<2x32xi1>, vector<2x32xf32>
    %403 = vector.shape_cast %375 : vector<2x1xi1> to vector<2x1xi1>
    %404 = vector.broadcast %403 : vector<2x1xi1> to vector<2x32xi1>
    %405 = arith.select %404, %399, %327 : vector<2x32xi1>, vector<2x32xf32>
    %cst_85 = arith.constant 0.000000e+00 : f32
    %406 = vector.shape_cast %375 : vector<2x1xi1> to vector<2x1xi1>
    %407 = vector.broadcast %406 : vector<2x1xi1> to vector<2x32xi1>
    %408 = vector.broadcast %cst_85 : f32 to vector<2x32xf32>
    %409 = arith.select %407, %399, %408 : vector<2x32xi1>, vector<2x32xf32>
    %410 = tpu.concatenate %372, %409 in 1 : vector<2x32xf32>, vector<2x32xf32> -> vector<2x64xf32>
    %c4_86 = arith.constant 4 : index
    %c0_87 = arith.constant 0 : index
    %c0_88 = arith.constant 0 : index
    %411 = vector.load %arg10[%c4_86, %c0_87, %c0_88] : memref<8x2x64xf32, #tpu.memory_space<vmem>>, vector<1x2x64xf32>
    %412 = vector.shape_cast %411 : vector<1x2x64xf32> to vector<2x64xf32>
    %413 = vector.shape_cast %410 : vector<2x64xf32> to vector<1x2x64xf32>
    tpu.vector_store %arg10[%c4_86, %c0_87, %c0_88], %413 {strides = array<i32>} : memref<8x2x64xf32, #tpu.memory_space<vmem>>, vector<1x2x64xf32>,
    %c5_i32_89 = arith.constant 5 : i32
    %414 = arith.addi %21, %c5_i32_89 : i32
    %415 = vector.broadcast %414 : i32 to vector<2x1xi32>
    %416 = arith.cmpi slt, %415, %3 : vector<2x1xi32>
    %c5_90 = arith.constant 5 : index
    %c0_91 = arith.constant 0 : index
    %c0_92 = arith.constant 0 : index
    %417 = vector.load %arg2[%c5_90, %c0_91, %c0_92] : memref<8x2x128xf32, #tpu.memory_space<vmem>>, vector<1x2x128xf32>
    %418 = vector.shape_cast %417 : vector<1x2x128xf32> to vector<2x128xf32>
    %cst_93 = arith.constant dense<0.000000e+00> : vector<2x128xf32>
    %419 = tpu.matmul %368, %15, %cst_93 {dimension_numbers = #tpu.dot_dimension_numbers<[1], [0], [0], [1], [0, 0, 1, 1], [], []>} : vector<2x32xf32>, vector<32x128xf32>, vector<2x128xf32> -> vector<2x128xf32>
    %420 = arith.addf %418, %419 : vector<2x128xf32>
    %421 = vector.broadcast %12 : vector<1x128xf32> to vector<2x128xf32>
    %422 = arith.mulf %420, %421 : vector<2x128xf32>
    %423 = arith.negf %422 : vector<2x128xf32>
    %424 = math.exp %423 : vector<2x128xf32>
    %cst_94 = arith.constant 1.000000e+00 : f32
    %425 = vector.broadcast %cst_94 : f32 to vector<2x128xf32>
    %426 = arith.addf %425, %424 : vector<2x128xf32>
    %427 = arith.divf %425, %426 : vector<2x128xf32>
    %428 = vector.broadcast %12 : vector<1x128xf32> to vector<2x128xf32>
    %429 = arith.mulf %427, %428 : vector<2x128xf32>
    %430 = vector.broadcast %14 : vector<1x128xf32> to vector<2x128xf32>
    %431 = arith.subf %429, %430 : vector<2x128xf32>
    %432 = vector.extract_strided_slice %431 {offsets = [0, 0], sizes = [2, 32], strides = [1, 1]} : vector<2x128xf32> to vector<2x32xf32>
    %433 = vector.extract_strided_slice %431 {offsets = [0, 32], sizes = [2, 32], strides = [1, 1]} : vector<2x128xf32> to vector<2x32xf32>
    %434 = vector.extract_strided_slice %431 {offsets = [0, 64], sizes = [2, 32], strides = [1, 1]} : vector<2x128xf32> to vector<2x32xf32>
    %435 = vector.extract_strided_slice %431 {offsets = [0, 96], sizes = [2, 32], strides = [1, 1]} : vector<2x128xf32> to vector<2x32xf32>
    %436 = arith.mulf %433, %365 : vector<2x32xf32>
    %437 = arith.mulf %432, %434 : vector<2x32xf32>
    %438 = arith.addf %436, %437 : vector<2x32xf32>
    %439 = math.tanh %438 : vector<2x32xf32>
    %440 = arith.mulf %435, %439 : vector<2x32xf32>
    %441 = vector.shape_cast %416 : vector<2x1xi1> to vector<2x1xi1>
    %442 = vector.broadcast %441 : vector<2x1xi1> to vector<2x32xi1>
    %443 = arith.select %442, %438, %365 : vector<2x32xi1>, vector<2x32xf32>
    %444 = vector.shape_cast %416 : vector<2x1xi1> to vector<2x1xi1>
    %445 = vector.broadcast %444 : vector<2x1xi1> to vector<2x32xi1>
    %446 = arith.select %445, %440, %368 : vector<2x32xi1>, vector<2x32xf32>
    %cst_95 = arith.constant 0.000000e+00 : f32
    %447 = vector.shape_cast %416 : vector<2x1xi1> to vector<2x1xi1>
    %448 = vector.broadcast %447 : vector<2x1xi1> to vector<2x32xi1>
    %449 = vector.broadcast %cst_95 : f32 to vector<2x32xf32>
    %450 = arith.select %448, %440, %449 : vector<2x32xi1>, vector<2x32xf32>
    %c2_i32_96 = arith.constant 2 : i32
    %451 = arith.addi %23, %c2_i32_96 : i32
    %452 = vector.broadcast %451 : i32 to vector<2x1xi32>
    %453 = arith.cmpi slt, %452, %3 : vector<2x1xi32>
    %c2_97 = arith.constant 2 : index
    %c0_98 = arith.constant 0 : index
    %c0_99 = arith.constant 0 : index
    %454 = vector.load %arg3[%c2_97, %c0_98, %c0_99] : memref<8x2x128xf32, #tpu.memory_space<vmem>>, vector<1x2x128xf32>
    %455 = vector.shape_cast %454 : vector<1x2x128xf32> to vector<2x128xf32>
    %cst_100 = arith.constant dense<0.000000e+00> : vector<2x128xf32>
    %456 = tpu.matmul %405, %16, %cst_100 {dimension_numbers = #tpu.dot_dimension_numbers<[1], [0], [0], [1], [0, 0, 1, 1], [], []>} : vector<2x32xf32>, vector<32x128xf32>, vector<2x128xf32> -> vector<2x128xf32>
    %457 = arith.addf %455, %456 : vector<2x128xf32>
    %458 = vector.broadcast %12 : vector<1x128xf32> to vector<2x128xf32>
    %459 = arith.mulf %457, %458 : vector<2x128xf32>
    %460 = arith.negf %459 : vector<2x128xf32>
    %461 = math.exp %460 : vector<2x128xf32>
    %cst_101 = arith.constant 1.000000e+00 : f32
    %462 = vector.broadcast %cst_101 : f32 to vector<2x128xf32>
    %463 = arith.addf %462, %461 : vector<2x128xf32>
    %464 = arith.divf %462, %463 : vector<2x128xf32>
    %465 = vector.broadcast %12 : vector<1x128xf32> to vector<2x128xf32>
    %466 = arith.mulf %464, %465 : vector<2x128xf32>
    %467 = vector.broadcast %14 : vector<1x128xf32> to vector<2x128xf32>
    %468 = arith.subf %466, %467 : vector<2x128xf32>
    %469 = vector.extract_strided_slice %468 {offsets = [0, 0], sizes = [2, 32], strides = [1, 1]} : vector<2x128xf32> to vector<2x32xf32>
    %470 = vector.extract_strided_slice %468 {offsets = [0, 32], sizes = [2, 32], strides = [1, 1]} : vector<2x128xf32> to vector<2x32xf32>
    %471 = vector.extract_strided_slice %468 {offsets = [0, 64], sizes = [2, 32], strides = [1, 1]} : vector<2x128xf32> to vector<2x32xf32>
    %472 = vector.extract_strided_slice %468 {offsets = [0, 96], sizes = [2, 32], strides = [1, 1]} : vector<2x128xf32> to vector<2x32xf32>
    %473 = arith.mulf %470, %402 : vector<2x32xf32>
    %474 = arith.mulf %469, %471 : vector<2x32xf32>
    %475 = arith.addf %473, %474 : vector<2x32xf32>
    %476 = math.tanh %475 : vector<2x32xf32>
    %477 = arith.mulf %472, %476 : vector<2x32xf32>
    %478 = vector.shape_cast %453 : vector<2x1xi1> to vector<2x1xi1>
    %479 = vector.broadcast %478 : vector<2x1xi1> to vector<2x32xi1>
    %480 = arith.select %479, %475, %402 : vector<2x32xi1>, vector<2x32xf32>
    %481 = vector.shape_cast %453 : vector<2x1xi1> to vector<2x1xi1>
    %482 = vector.broadcast %481 : vector<2x1xi1> to vector<2x32xi1>
    %483 = arith.select %482, %477, %405 : vector<2x32xi1>, vector<2x32xf32>
    %cst_102 = arith.constant 0.000000e+00 : f32
    %484 = vector.shape_cast %453 : vector<2x1xi1> to vector<2x1xi1>
    %485 = vector.broadcast %484 : vector<2x1xi1> to vector<2x32xi1>
    %486 = vector.broadcast %cst_102 : f32 to vector<2x32xf32>
    %487 = arith.select %485, %477, %486 : vector<2x32xi1>, vector<2x32xf32>
    %488 = tpu.concatenate %450, %487 in 1 : vector<2x32xf32>, vector<2x32xf32> -> vector<2x64xf32>
    %c5_103 = arith.constant 5 : index
    %c0_104 = arith.constant 0 : index
    %c0_105 = arith.constant 0 : index
    %489 = vector.load %arg10[%c5_103, %c0_104, %c0_105] : memref<8x2x64xf32, #tpu.memory_space<vmem>>, vector<1x2x64xf32>
    %490 = vector.shape_cast %489 : vector<1x2x64xf32> to vector<2x64xf32>
    %491 = vector.shape_cast %488 : vector<2x64xf32> to vector<1x2x64xf32>
    tpu.vector_store %arg10[%c5_103, %c0_104, %c0_105], %491 {strides = array<i32>} : memref<8x2x64xf32, #tpu.memory_space<vmem>>, vector<1x2x64xf32>,
    %c6_i32_106 = arith.constant 6 : i32
    %492 = arith.addi %21, %c6_i32_106 : i32
    %493 = vector.broadcast %492 : i32 to vector<2x1xi32>
    %494 = arith.cmpi slt, %493, %3 : vector<2x1xi32>
    %c6_107 = arith.constant 6 : index
    %c0_108 = arith.constant 0 : index
    %c0_109 = arith.constant 0 : index
    %495 = vector.load %arg2[%c6_107, %c0_108, %c0_109] : memref<8x2x128xf32, #tpu.memory_space<vmem>>, vector<1x2x128xf32>
    %496 = vector.shape_cast %495 : vector<1x2x128xf32> to vector<2x128xf32>
    %cst_110 = arith.constant dense<0.000000e+00> : vector<2x128xf32>
    %497 = tpu.matmul %446, %15, %cst_110 {dimension_numbers = #tpu.dot_dimension_numbers<[1], [0], [0], [1], [0, 0, 1, 1], [], []>} : vector<2x32xf32>, vector<32x128xf32>, vector<2x128xf32> -> vector<2x128xf32>
    %498 = arith.addf %496, %497 : vector<2x128xf32>
    %499 = vector.broadcast %12 : vector<1x128xf32> to vector<2x128xf32>
    %500 = arith.mulf %498, %499 : vector<2x128xf32>
    %501 = arith.negf %500 : vector<2x128xf32>
    %502 = math.exp %501 : vector<2x128xf32>
    %cst_111 = arith.constant 1.000000e+00 : f32
    %503 = vector.broadcast %cst_111 : f32 to vector<2x128xf32>
    %504 = arith.addf %503, %502 : vector<2x128xf32>
    %505 = arith.divf %503, %504 : vector<2x128xf32>
    %506 = vector.broadcast %12 : vector<1x128xf32> to vector<2x128xf32>
    %507 = arith.mulf %505, %506 : vector<2x128xf32>
    %508 = vector.broadcast %14 : vector<1x128xf32> to vector<2x128xf32>
    %509 = arith.subf %507, %508 : vector<2x128xf32>
    %510 = vector.extract_strided_slice %509 {offsets = [0, 0], sizes = [2, 32], strides = [1, 1]} : vector<2x128xf32> to vector<2x32xf32>
    %511 = vector.extract_strided_slice %509 {offsets = [0, 32], sizes = [2, 32], strides = [1, 1]} : vector<2x128xf32> to vector<2x32xf32>
    %512 = vector.extract_strided_slice %509 {offsets = [0, 64], sizes = [2, 32], strides = [1, 1]} : vector<2x128xf32> to vector<2x32xf32>
    %513 = vector.extract_strided_slice %509 {offsets = [0, 96], sizes = [2, 32], strides = [1, 1]} : vector<2x128xf32> to vector<2x32xf32>
    %514 = arith.mulf %511, %443 : vector<2x32xf32>
    %515 = arith.mulf %510, %512 : vector<2x32xf32>
    %516 = arith.addf %514, %515 : vector<2x32xf32>
    %517 = math.tanh %516 : vector<2x32xf32>
    %518 = arith.mulf %513, %517 : vector<2x32xf32>
    %519 = vector.shape_cast %494 : vector<2x1xi1> to vector<2x1xi1>
    %520 = vector.broadcast %519 : vector<2x1xi1> to vector<2x32xi1>
    %521 = arith.select %520, %516, %443 : vector<2x32xi1>, vector<2x32xf32>
    %522 = vector.shape_cast %494 : vector<2x1xi1> to vector<2x1xi1>
    %523 = vector.broadcast %522 : vector<2x1xi1> to vector<2x32xi1>
    %524 = arith.select %523, %518, %446 : vector<2x32xi1>, vector<2x32xf32>
    %cst_112 = arith.constant 0.000000e+00 : f32
    %525 = vector.shape_cast %494 : vector<2x1xi1> to vector<2x1xi1>
    %526 = vector.broadcast %525 : vector<2x1xi1> to vector<2x32xi1>
    %527 = vector.broadcast %cst_112 : f32 to vector<2x32xf32>
    %528 = arith.select %526, %518, %527 : vector<2x32xi1>, vector<2x32xf32>
    %c1_i32_113 = arith.constant 1 : i32
    %529 = arith.addi %23, %c1_i32_113 : i32
    %530 = vector.broadcast %529 : i32 to vector<2x1xi32>
    %531 = arith.cmpi slt, %530, %3 : vector<2x1xi32>
    %c1_114 = arith.constant 1 : index
    %c0_115 = arith.constant 0 : index
    %c0_116 = arith.constant 0 : index
    %532 = vector.load %arg3[%c1_114, %c0_115, %c0_116] : memref<8x2x128xf32, #tpu.memory_space<vmem>>, vector<1x2x128xf32>
    %533 = vector.shape_cast %532 : vector<1x2x128xf32> to vector<2x128xf32>
    %cst_117 = arith.constant dense<0.000000e+00> : vector<2x128xf32>
    %534 = tpu.matmul %483, %16, %cst_117 {dimension_numbers = #tpu.dot_dimension_numbers<[1], [0], [0], [1], [0, 0, 1, 1], [], []>} : vector<2x32xf32>, vector<32x128xf32>, vector<2x128xf32> -> vector<2x128xf32>
    %535 = arith.addf %533, %534 : vector<2x128xf32>
    %536 = vector.broadcast %12 : vector<1x128xf32> to vector<2x128xf32>
    %537 = arith.mulf %535, %536 : vector<2x128xf32>
    %538 = arith.negf %537 : vector<2x128xf32>
    %539 = math.exp %538 : vector<2x128xf32>
    %cst_118 = arith.constant 1.000000e+00 : f32
    %540 = vector.broadcast %cst_118 : f32 to vector<2x128xf32>
    %541 = arith.addf %540, %539 : vector<2x128xf32>
    %542 = arith.divf %540, %541 : vector<2x128xf32>
    %543 = vector.broadcast %12 : vector<1x128xf32> to vector<2x128xf32>
    %544 = arith.mulf %542, %543 : vector<2x128xf32>
    %545 = vector.broadcast %14 : vector<1x128xf32> to vector<2x128xf32>
    %546 = arith.subf %544, %545 : vector<2x128xf32>
    %547 = vector.extract_strided_slice %546 {offsets = [0, 0], sizes = [2, 32], strides = [1, 1]} : vector<2x128xf32> to vector<2x32xf32>
    %548 = vector.extract_strided_slice %546 {offsets = [0, 32], sizes = [2, 32], strides = [1, 1]} : vector<2x128xf32> to vector<2x32xf32>
    %549 = vector.extract_strided_slice %546 {offsets = [0, 64], sizes = [2, 32], strides = [1, 1]} : vector<2x128xf32> to vector<2x32xf32>
    %550 = vector.extract_strided_slice %546 {offsets = [0, 96], sizes = [2, 32], strides = [1, 1]} : vector<2x128xf32> to vector<2x32xf32>
    %551 = arith.mulf %548, %480 : vector<2x32xf32>
    %552 = arith.mulf %547, %549 : vector<2x32xf32>
    %553 = arith.addf %551, %552 : vector<2x32xf32>
    %554 = math.tanh %553 : vector<2x32xf32>
    %555 = arith.mulf %550, %554 : vector<2x32xf32>
    %556 = vector.shape_cast %531 : vector<2x1xi1> to vector<2x1xi1>
    %557 = vector.broadcast %556 : vector<2x1xi1> to vector<2x32xi1>
    %558 = arith.select %557, %553, %480 : vector<2x32xi1>, vector<2x32xf32>
    %559 = vector.shape_cast %531 : vector<2x1xi1> to vector<2x1xi1>
    %560 = vector.broadcast %559 : vector<2x1xi1> to vector<2x32xi1>
    %561 = arith.select %560, %555, %483 : vector<2x32xi1>, vector<2x32xf32>
    %cst_119 = arith.constant 0.000000e+00 : f32
    %562 = vector.shape_cast %531 : vector<2x1xi1> to vector<2x1xi1>
    %563 = vector.broadcast %562 : vector<2x1xi1> to vector<2x32xi1>
    %564 = vector.broadcast %cst_119 : f32 to vector<2x32xf32>
    %565 = arith.select %563, %555, %564 : vector<2x32xi1>, vector<2x32xf32>
    %566 = tpu.concatenate %528, %565 in 1 : vector<2x32xf32>, vector<2x32xf32> -> vector<2x64xf32>
    %c6_120 = arith.constant 6 : index
    %c0_121 = arith.constant 0 : index
    %c0_122 = arith.constant 0 : index
    %567 = vector.load %arg10[%c6_120, %c0_121, %c0_122] : memref<8x2x64xf32, #tpu.memory_space<vmem>>, vector<1x2x64xf32>
    %568 = vector.shape_cast %567 : vector<1x2x64xf32> to vector<2x64xf32>
    %569 = vector.shape_cast %566 : vector<2x64xf32> to vector<1x2x64xf32>
    tpu.vector_store %arg10[%c6_120, %c0_121, %c0_122], %569 {strides = array<i32>} : memref<8x2x64xf32, #tpu.memory_space<vmem>>, vector<1x2x64xf32>,
    %c7_i32_123 = arith.constant 7 : i32
    %570 = arith.addi %21, %c7_i32_123 : i32
    %571 = vector.broadcast %570 : i32 to vector<2x1xi32>
    %572 = arith.cmpi slt, %571, %3 : vector<2x1xi32>
    %c7_124 = arith.constant 7 : index
    %c0_125 = arith.constant 0 : index
    %c0_126 = arith.constant 0 : index
    %573 = vector.load %arg2[%c7_124, %c0_125, %c0_126] : memref<8x2x128xf32, #tpu.memory_space<vmem>>, vector<1x2x128xf32>
    %574 = vector.shape_cast %573 : vector<1x2x128xf32> to vector<2x128xf32>
    %cst_127 = arith.constant dense<0.000000e+00> : vector<2x128xf32>
    %575 = tpu.matmul %524, %15, %cst_127 {dimension_numbers = #tpu.dot_dimension_numbers<[1], [0], [0], [1], [0, 0, 1, 1], [], []>} : vector<2x32xf32>, vector<32x128xf32>, vector<2x128xf32> -> vector<2x128xf32>
    %576 = arith.addf %574, %575 : vector<2x128xf32>
    %577 = vector.broadcast %12 : vector<1x128xf32> to vector<2x128xf32>
    %578 = arith.mulf %576, %577 : vector<2x128xf32>
    %579 = arith.negf %578 : vector<2x128xf32>
    %580 = math.exp %579 : vector<2x128xf32>
    %cst_128 = arith.constant 1.000000e+00 : f32
    %581 = vector.broadcast %cst_128 : f32 to vector<2x128xf32>
    %582 = arith.addf %581, %580 : vector<2x128xf32>
    %583 = arith.divf %581, %582 : vector<2x128xf32>
    %584 = vector.broadcast %12 : vector<1x128xf32> to vector<2x128xf32>
    %585 = arith.mulf %583, %584 : vector<2x128xf32>
    %586 = vector.broadcast %14 : vector<1x128xf32> to vector<2x128xf32>
    %587 = arith.subf %585, %586 : vector<2x128xf32>
    %588 = vector.extract_strided_slice %587 {offsets = [0, 0], sizes = [2, 32], strides = [1, 1]} : vector<2x128xf32> to vector<2x32xf32>
    %589 = vector.extract_strided_slice %587 {offsets = [0, 32], sizes = [2, 32], strides = [1, 1]} : vector<2x128xf32> to vector<2x32xf32>
    %590 = vector.extract_strided_slice %587 {offsets = [0, 64], sizes = [2, 32], strides = [1, 1]} : vector<2x128xf32> to vector<2x32xf32>
    %591 = vector.extract_strided_slice %587 {offsets = [0, 96], sizes = [2, 32], strides = [1, 1]} : vector<2x128xf32> to vector<2x32xf32>
    %592 = arith.mulf %589, %521 : vector<2x32xf32>
    %593 = arith.mulf %588, %590 : vector<2x32xf32>
    %594 = arith.addf %592, %593 : vector<2x32xf32>
    %595 = math.tanh %594 : vector<2x32xf32>
    %596 = arith.mulf %591, %595 : vector<2x32xf32>
    %597 = vector.shape_cast %572 : vector<2x1xi1> to vector<2x1xi1>
    %598 = vector.broadcast %597 : vector<2x1xi1> to vector<2x32xi1>
    %599 = arith.select %598, %594, %521 : vector<2x32xi1>, vector<2x32xf32>
    %600 = vector.shape_cast %572 : vector<2x1xi1> to vector<2x1xi1>
    %601 = vector.broadcast %600 : vector<2x1xi1> to vector<2x32xi1>
    %602 = arith.select %601, %596, %524 : vector<2x32xi1>, vector<2x32xf32>
    %cst_129 = arith.constant 0.000000e+00 : f32
    %603 = vector.shape_cast %572 : vector<2x1xi1> to vector<2x1xi1>
    %604 = vector.broadcast %603 : vector<2x1xi1> to vector<2x32xi1>
    %605 = vector.broadcast %cst_129 : f32 to vector<2x32xf32>
    %606 = arith.select %604, %596, %605 : vector<2x32xi1>, vector<2x32xf32>
    %c0_i32_130 = arith.constant 0 : i32
    %607 = arith.addi %23, %c0_i32_130 : i32
    %608 = vector.broadcast %607 : i32 to vector<2x1xi32>
    %609 = arith.cmpi slt, %608, %3 : vector<2x1xi32>
    %c0_131 = arith.constant 0 : index
    %c0_132 = arith.constant 0 : index
    %c0_133 = arith.constant 0 : index
    %610 = vector.load %arg3[%c0_131, %c0_132, %c0_133] : memref<8x2x128xf32, #tpu.memory_space<vmem>>, vector<1x2x128xf32>
    %611 = vector.shape_cast %610 : vector<1x2x128xf32> to vector<2x128xf32>
    %cst_134 = arith.constant dense<0.000000e+00> : vector<2x128xf32>
    %612 = tpu.matmul %561, %16, %cst_134 {dimension_numbers = #tpu.dot_dimension_numbers<[1], [0], [0], [1], [0, 0, 1, 1], [], []>} : vector<2x32xf32>, vector<32x128xf32>, vector<2x128xf32> -> vector<2x128xf32>
    %613 = arith.addf %611, %612 : vector<2x128xf32>
    %614 = vector.broadcast %12 : vector<1x128xf32> to vector<2x128xf32>
    %615 = arith.mulf %613, %614 : vector<2x128xf32>
    %616 = arith.negf %615 : vector<2x128xf32>
    %617 = math.exp %616 : vector<2x128xf32>
    %cst_135 = arith.constant 1.000000e+00 : f32
    %618 = vector.broadcast %cst_135 : f32 to vector<2x128xf32>
    %619 = arith.addf %618, %617 : vector<2x128xf32>
    %620 = arith.divf %618, %619 : vector<2x128xf32>
    %621 = vector.broadcast %12 : vector<1x128xf32> to vector<2x128xf32>
    %622 = arith.mulf %620, %621 : vector<2x128xf32>
    %623 = vector.broadcast %14 : vector<1x128xf32> to vector<2x128xf32>
    %624 = arith.subf %622, %623 : vector<2x128xf32>
    %625 = vector.extract_strided_slice %624 {offsets = [0, 0], sizes = [2, 32], strides = [1, 1]} : vector<2x128xf32> to vector<2x32xf32>
    %626 = vector.extract_strided_slice %624 {offsets = [0, 32], sizes = [2, 32], strides = [1, 1]} : vector<2x128xf32> to vector<2x32xf32>
    %627 = vector.extract_strided_slice %624 {offsets = [0, 64], sizes = [2, 32], strides = [1, 1]} : vector<2x128xf32> to vector<2x32xf32>
    %628 = vector.extract_strided_slice %624 {offsets = [0, 96], sizes = [2, 32], strides = [1, 1]} : vector<2x128xf32> to vector<2x32xf32>
    %629 = arith.mulf %626, %558 : vector<2x32xf32>
    %630 = arith.mulf %625, %627 : vector<2x32xf32>
    %631 = arith.addf %629, %630 : vector<2x32xf32>
    %632 = math.tanh %631 : vector<2x32xf32>
    %633 = arith.mulf %628, %632 : vector<2x32xf32>
    %634 = vector.shape_cast %609 : vector<2x1xi1> to vector<2x1xi1>
    %635 = vector.broadcast %634 : vector<2x1xi1> to vector<2x32xi1>
    %636 = arith.select %635, %631, %558 : vector<2x32xi1>, vector<2x32xf32>
    %637 = vector.shape_cast %609 : vector<2x1xi1> to vector<2x1xi1>
    %638 = vector.broadcast %637 : vector<2x1xi1> to vector<2x32xi1>
    %639 = arith.select %638, %633, %561 : vector<2x32xi1>, vector<2x32xf32>
    %cst_136 = arith.constant 0.000000e+00 : f32
    %640 = vector.shape_cast %609 : vector<2x1xi1> to vector<2x1xi1>
    %641 = vector.broadcast %640 : vector<2x1xi1> to vector<2x32xi1>
    %642 = vector.broadcast %cst_136 : f32 to vector<2x32xf32>
    %643 = arith.select %641, %633, %642 : vector<2x32xi1>, vector<2x32xf32>
    %644 = tpu.concatenate %606, %643 in 1 : vector<2x32xf32>, vector<2x32xf32> -> vector<2x64xf32>
    %c7_137 = arith.constant 7 : index
    %c0_138 = arith.constant 0 : index
    %c0_139 = arith.constant 0 : index
    %645 = vector.load %arg10[%c7_137, %c0_138, %c0_139] : memref<8x2x64xf32, #tpu.memory_space<vmem>>, vector<1x2x64xf32>
    %646 = vector.shape_cast %645 : vector<1x2x64xf32> to vector<2x64xf32>
    %647 = vector.shape_cast %644 : vector<2x64xf32> to vector<1x2x64xf32>
    tpu.vector_store %arg10[%c7_137, %c0_138, %c0_139], %647 {strides = array<i32>} : memref<8x2x64xf32, #tpu.memory_space<vmem>>, vector<1x2x64xf32>,
    %c0_140 = arith.constant 0 : index
    %c0_141 = arith.constant 0 : index
    %648 = vector.load %arg15[%c0_140, %c0_141] : memref<2x32xf32, #tpu.memory_space<vmem>>, vector<2x32xf32>
    tpu.vector_store %arg15[%c0_140, %c0_141], %602 {strides = array<i32>} : memref<2x32xf32, #tpu.memory_space<vmem>>, vector<2x32xf32>,
    %c0_142 = arith.constant 0 : index
    %c0_143 = arith.constant 0 : index
    %649 = vector.load %arg16[%c0_142, %c0_143] : memref<2x32xf32, #tpu.memory_space<vmem>>, vector<2x32xf32>
    tpu.vector_store %arg16[%c0_142, %c0_143], %599 {strides = array<i32>} : memref<2x32xf32, #tpu.memory_space<vmem>>, vector<2x32xf32>,
    %c0_144 = arith.constant 0 : index
    %c0_145 = arith.constant 0 : index
    %650 = vector.load %arg17[%c0_144, %c0_145] : memref<2x32xf32, #tpu.memory_space<vmem>>, vector<2x32xf32>
    tpu.vector_store %arg17[%c0_144, %c0_145], %639 {strides = array<i32>} : memref<2x32xf32, #tpu.memory_space<vmem>>, vector<2x32xf32>,
    %c0_146 = arith.constant 0 : index
    %c0_147 = arith.constant 0 : index
    %651 = vector.load %arg18[%c0_146, %c0_147] : memref<2x32xf32, #tpu.memory_space<vmem>>, vector<2x32xf32>
    tpu.vector_store %arg18[%c0_146, %c0_147], %636 {strides = array<i32>} : memref<2x32xf32, #tpu.memory_space<vmem>>, vector<2x32xf32>,
    %c0_i32_148 = arith.constant 0 : i32
    %652 = arith.cmpi eq, %arg0, %c0_i32_148 : i32
    %653 = arith.extui %652 : i1 to i32
    %c0_i32_149 = arith.constant 0 : i32
    %654 = arith.cmpi ne, %653, %c0_i32_149 : i32
    scf.if %654 {
      %655 = tpu.concatenate %602, %639 in 1 : vector<2x32xf32>, vector<2x32xf32> -> vector<2x64xf32>
      %656 = tpu.concatenate %599, %636 in 1 : vector<2x32xf32>, vector<2x32xf32> -> vector<2x64xf32>
      %c0_150 = arith.constant 0 : index
      %c0_151 = arith.constant 0 : index
      %657 = vector.load %arg11[%c0_150, %c0_151] : memref<2x64xf32, #tpu.memory_space<vmem>>, vector<2x64xf32>
      tpu.vector_store %arg11[%c0_150, %c0_151], %655 {strides = array<i32>} : memref<2x64xf32, #tpu.memory_space<vmem>>, vector<2x64xf32>,
      %c0_152 = arith.constant 0 : index
      %c0_153 = arith.constant 0 : index
      %658 = vector.load %arg12[%c0_152, %c0_153] : memref<2x64xf32, #tpu.memory_space<vmem>>, vector<2x64xf32>
      tpu.vector_store %arg12[%c0_152, %c0_153], %656 {strides = array<i32>} : memref<2x64xf32, #tpu.memory_space<vmem>>, vector<2x64xf32>,
      %c0_154 = arith.constant 0 : index
      %c0_155 = arith.constant 0 : index
      %659 = vector.load %arg6[%c0_154, %c0_155] : memref<64x32xf32, #tpu.memory_space<vmem>>, vector<64x32xf32>
      %cst_156 = arith.constant dense<0.000000e+00> : vector<2x32xf32>
      %660 = tpu.matmul %655, %659, %cst_156 {dimension_numbers = #tpu.dot_dimension_numbers<[1], [0], [0], [1], [0, 0, 1, 1], [], []>} : vector<2x64xf32>, vector<64x32xf32>, vector<2x32xf32> -> vector<2x32xf32>
      %c0_157 = arith.constant 0 : index
      %c0_158 = arith.constant 0 : index
      %661 = vector.load %arg7[%c0_157, %c0_158] : memref<1x32xf32, #tpu.memory_space<vmem>>, vector<1x32xf32>
      %662 = vector.broadcast %661 : vector<1x32xf32> to vector<2x32xf32>
      %663 = arith.addf %660, %662 : vector<2x32xf32>
      %c0_159 = arith.constant 0 : index
      %c0_160 = arith.constant 0 : index
      %664 = vector.load %arg13[%c0_159, %c0_160] : memref<2x32xf32, #tpu.memory_space<vmem>>, vector<2x32xf32>
      tpu.vector_store %arg13[%c0_159, %c0_160], %663 {strides = array<i32>} : memref<2x32xf32, #tpu.memory_space<vmem>>, vector<2x32xf32>,
      %c0_161 = arith.constant 0 : index
      %c0_162 = arith.constant 0 : index
      %665 = vector.load %arg8[%c0_161, %c0_162] : memref<64x32xf32, #tpu.memory_space<vmem>>, vector<64x32xf32>
      %cst_163 = arith.constant dense<0.000000e+00> : vector<2x32xf32>
      %666 = tpu.matmul %656, %665, %cst_163 {dimension_numbers = #tpu.dot_dimension_numbers<[1], [0], [0], [1], [0, 0, 1, 1], [], []>} : vector<2x64xf32>, vector<64x32xf32>, vector<2x32xf32> -> vector<2x32xf32>
      %c0_164 = arith.constant 0 : index
      %c0_165 = arith.constant 0 : index
      %667 = vector.load %arg9[%c0_164, %c0_165] : memref<1x32xf32, #tpu.memory_space<vmem>>, vector<1x32xf32>
      %668 = vector.broadcast %667 : vector<1x32xf32> to vector<2x32xf32>
      %669 = arith.addf %666, %668 : vector<2x32xf32>
      %c0_166 = arith.constant 0 : index
      %c0_167 = arith.constant 0 : index
      %670 = vector.load %arg14[%c0_166, %c0_167] : memref<2x32xf32, #tpu.memory_space<vmem>>, vector<2x32xf32>
      tpu.vector_store %arg14[%c0_166, %c0_167], %669 {strides = array<i32>} : memref<2x32xf32, #tpu.memory_space<vmem>>, vector<2x32xf32>,
    } else {
    }
    return
  }
  func.func @transform_0(%arg0: i32) -> (i32, i32) {
    %c0_i32 = arith.constant 0 : i32
    %c0_i32_0 = arith.constant 0 : i32
    %c0_i32_1 = arith.constant 0 : i32
    return %c0_i32, %c0_i32_0 : i32, i32
  }
  func.func @transform_1(%arg0: i32) -> (i32, i32, i32) {
    %c0_i32 = arith.constant 0 : i32
    %c0_i32_0 = arith.constant 0 : i32
    %c0_i32_1 = arith.constant 0 : i32
    return %arg0, %c0_i32, %c0_i32_0 : i32, i32, i32
  }
  func.func @transform_2(%arg0: i32) -> (i32, i32, i32) {
    %c0_i32 = arith.constant 0 : i32
    %0 = arith.subi %c0_i32, %arg0 : i32
    %c0_i32_0 = arith.constant 0 : i32
    %c0_i32_1 = arith.constant 0 : i32
    %c0_i32_2 = arith.constant 0 : i32
    return %0, %c0_i32_0, %c0_i32_1 : i32, i32, i32
  }
  func.func @transform_3(%arg0: i32) -> (i32, i32) {
    %c0_i32 = arith.constant 0 : i32
    %c0_i32_0 = arith.constant 0 : i32
    %c0_i32_1 = arith.constant 0 : i32
    return %c0_i32, %c0_i32_0 : i32, i32
  }
  func.func @transform_4(%arg0: i32) -> (i32, i32) {
    %c0_i32 = arith.constant 0 : i32
    %c0_i32_0 = arith.constant 0 : i32
    %c0_i32_1 = arith.constant 0 : i32
    return %c0_i32, %c0_i32_0 : i32, i32
  }
  func.func @transform_5(%arg0: i32) -> (i32, i32) {
    %c0_i32 = arith.constant 0 : i32
    %c0_i32_0 = arith.constant 0 : i32
    %c0_i32_1 = arith.constant 0 : i32
    return %c0_i32, %c0_i32_0 : i32, i32
  }
  func.func @transform_6(%arg0: i32) -> (i32, i32) {
    %c0_i32 = arith.constant 0 : i32
    %c0_i32_0 = arith.constant 0 : i32
    %c0_i32_1 = arith.constant 0 : i32
    return %c0_i32, %c0_i32_0 : i32, i32
  }
  func.func @transform_7(%arg0: i32) -> (i32, i32) {
    %c0_i32 = arith.constant 0 : i32
    %c0_i32_0 = arith.constant 0 : i32
    %c0_i32_1 = arith.constant 0 : i32
    return %c0_i32, %c0_i32_0 : i32, i32
  }
  func.func @transform_8(%arg0: i32) -> (i32, i32) {
    %c0_i32 = arith.constant 0 : i32
    %c0_i32_0 = arith.constant 0 : i32
    %c0_i32_1 = arith.constant 0 : i32
    return %c0_i32, %c0_i32_0 : i32, i32
  }
  func.func @transform_9(%arg0: i32) -> (i32, i32, i32) {
    %c0_i32 = arith.constant 0 : i32
    %c0_i32_0 = arith.constant 0 : i32
    %c0_i32_1 = arith.constant 0 : i32
    return %arg0, %c0_i32, %c0_i32_0 : i32, i32, i32
  }
  func.func @transform_10(%arg0: i32) -> (i32, i32) {
    %c0_i32 = arith.constant 0 : i32
    %c0_i32_0 = arith.constant 0 : i32
    %c0_i32_1 = arith.constant 0 : i32
    return %c0_i32, %c0_i32_0 : i32, i32
  }
  func.func @transform_11(%arg0: i32) -> (i32, i32) {
    %c0_i32 = arith.constant 0 : i32
    %c0_i32_0 = arith.constant 0 : i32
    %c0_i32_1 = arith.constant 0 : i32
    return %c0_i32, %c0_i32_0 : i32, i32
  }
  func.func @transform_12(%arg0: i32) -> (i32, i32) {
    %c0_i32 = arith.constant 0 : i32
    %c0_i32_0 = arith.constant 0 : i32
    %c0_i32_1 = arith.constant 0 : i32
    return %c0_i32, %c0_i32_0 : i32, i32
  }
  func.func @transform_13(%arg0: i32) -> (i32, i32) {
    %c0_i32 = arith.constant 0 : i32
    %c0_i32_0 = arith.constant 0 : i32
    %c0_i32_1 = arith.constant 0 : i32
    return %c0_i32, %c0_i32_0 : i32, i32
  }
}

</mosaic_0001>

<bundles_post_ra>
// kernel: tpu_custom_call.1
= control target key start
LH: loop header
LB: loop body
LE: loop exit
PB: predicated region body
PF: predicated region fallthrough
CT: control target
= control target key end

     0   :  { %19 = vsyncpa [#allocation7], 0  ;;  %s2837_s0 = inlined_call_operand.vmem [shape: s32[2,1], index: 0, kind: input, shape index: {}]   ;;  %s2838_s1 = inlined_call_operand.vmem [shape: f32[8,2,128], index: 1, kind: input, shape index: {}]   ;;  %s2839_s2 = inlined_call_operand.vmem [shape: f32[8,2,128], index: 2, kind: input, shape index: {}]   ;;  %s2840_s3 = inlined_call_operand.vmem [shape: f32[32,128], index: 3, kind: input, shape index: {}]   ;;  %s2841_s4 = inlined_call_operand.vmem [shape: f32[32,128], index: 4, kind: input, shape index: {}]   ;;  %s2842_s5 = inlined_call_operand.vmem [shape: f32[64,32], index: 5, kind: input, shape index: {}]   ;;  %s2843_s6 = inlined_call_operand.vmem [shape: f32[1,32], index: 6, kind: input, shape index: {}]   ;;  %s2844_s7 = inlined_call_operand.vmem [shape: f32[64,32], index: 7, kind: input, shape index: {}]   ;;  %s2845_s8 = inlined_call_operand.vmem [shape: f32[1,32], index: 8, kind: input, shape index: {}]   ;;  %s2846_s9 = inlined_call_operand.hbm [shape: f32[8,2,64], index: 9, kind: output, shape index: {0}]   ;;  %s2847_s10 = inlined_call_operand.hbm [shape: f32[2,64], index: 10, kind: output, shape index: {1}]   ;;  %s2848_s11 = inlined_call_operand.hbm [shape: f32[2,64], index: 11, kind: output, shape index: {2}]   ;;  %s2849_s12 = inlined_call_operand.hbm [shape: f32[2,32], index: 12, kind: output, shape index: {3}]   ;;  %s2850_s13 = inlined_call_operand.hbm [shape: f32[2,32], index: 13, kind: output, shape index: {4}]  }
   0x1   :  { %20 = vsyncpa [#allocation9], 0  ;;  %v2016_v0 = vld [vmem:[%s2840_s3 + $0x18] sm:$0xff]  ;;  %v2026_v2 = vld [vmem:[%s2840_s3 + $0x10] sm:$0xff]  ;;  %vm66_vm0 = vcmask 254976   ;;  %v1931_v4 = vmov 0.0  }
   0x2   :  { %v2021_v1 = vld [vmem:[%s2841_s4 + $0x18] sm:$0xff]  ;;  %113 = vmatpush.msra.mxu2 %v2016_v0  ;;  %v2033_v3 = vld [vmem:[%s2841_s4 + $0x10] sm:$0xff]  ;;  %67 = vst.msk [vmem:[#allocation2] sm:$0x3] %vm66_vm0, %v1931_v4  ;;  %v2039_v5 = vld [vmem:[%s2840_s3 + $0x8] sm:$0xff]  ;;  %459 = vmatpush.msra.mxu0 %v2016_v0  ;;  %vm97_vm1 = vcmask 261120  }
   0x3   :  { %196 = vmatpush.msra.mxu3 %v2021_v1  ;;  %v2044_v6 = vld [vmem:[%s2841_s4 + $0x8] sm:$0xff]  ;;  %68 = vst.msk [vmem:[#allocation3] sm:$0x3] %vm66_vm0, %v1931_v4  ;;  %537 = vmatpush.msra.mxu1 %v2021_v1  ;;  %v2055_v7 = vld [vmem:[%s2840_s3] sm:$0xff] }
   0x4   :  { %114 = vmatpush.msra.mxu2 %v2026_v2  ;;  %69 = vst.msk [vmem:[#allocation4] sm:$0x3] %vm66_vm0, %v1931_v4  ;;  %v2060_v8 = vld [vmem:[%s2841_s4] sm:$0xff]  ;;  %460 = vmatpush.msra.mxu0 %v2026_v2 }
   0x5   :  { %197 = vmatpush.msra.mxu3 %v2033_v3  ;;  %70 = vst.msk [vmem:[#allocation5] sm:$0x3] %vm66_vm0, %v1931_v4  ;;  %538 = vmatpush.msra.mxu1 %v2033_v3 }
   0x6   :  { %115 = vmatpush.msra.mxu2 %v2039_v5  ;;  %461 = vmatpush.msra.mxu0 %v2039_v5 }
   0x7   :  { %198 = vmatpush.msra.mxu3 %v2044_v6  ;;  %539 = vmatpush.msra.mxu1 %v2044_v6 }
   0x8   :  { %21 = vsyncpa [#allocation12], 0  ;;  %116 = vmatpush.msra.mxu2 %v2055_v7  ;;  %462 = vmatpush.msra.mxu0 %v2055_v7  ;;  %s1932_s3 = smov 32   ;;  %v72_v13 = vlaneseq  ;;  %v96_v15 = vld [vmem:[%s2838_s1] sm:$0x3]  ;;  %v1933_v16 = vmov 1.0  }
   0x9   :  { %199 = vmatpush.msra.mxu3 %v2060_v8  ;;  %v2071_v9 = vld [vmem:[#allocation2] sm:$0x3]  ;;  %540 = vmatpush.msra.mxu1 %v2060_v8  ;;  %v1632_v19 = vld [vmem:[%s2839_s2 + $0xe] sm:$0x3]  ;;  %s1934_s27 = smov 64   ;;  %v1935_v56 = vmov 0  }
   0xa   :  { %292 = vmatpush.msrb.mxu2 %v2016_v0  ;;  %v88_v10 = vld [vmem:[#allocation3] sm:$0x3]  ;;  %793 = vmatpush.msrb.mxu0 %v2016_v0  ;;  %v73_v14 = vand.u32 127, %v72_v13  ;;  %v2133_v61 = vld [vmem:[%s2837_s0] sm:$0x3]  ;;  %s1936_s30 = smov 96  }
   0xb   :  { %370 = vmatpush.msrb.mxu3 %v2021_v1  ;;  %1629 = vmatmul.msk.f32.vlgmr.msra.gmra.mxu2 %vm97_vm1, %v2071_v9  ;;  %v2078_v11 = vld [vmem:[#allocation4] sm:$0x3]  ;;  %vm1628_vm13 = vcmp.gt.s32.totalorder %v2133_v61, 0  ;;  %vm1631_vm14 = vcmp.gt.s32.totalorder %v2133_v61, 7  ;;  %s1561_s16 = sshll.u32 %s2847_s10, 4  ;;  %s1937_s17 = smov [#allocation8]   ;;  %s1562_s16 = int_to_ptr.hbm [resolvable:$true] %s1561_s16 }
   0xc   :  { %145 = vrot.lane.b32.xlu1 %v88_v10, %s1932_s3  ;;  %1633 = vmatmul.msk.f32.vlgmr.msra.gmra.mxu3 %vm97_vm1, %v2078_v11  ;;  %v90_v12 = vld [vmem:[#allocation5] sm:$0x3]  ;;  %vm74_vm2 = vcmp.ge.s32.totalorder %v73_v14, 64  ;;  %vm75_vm3 = vcmp.lt.s32.totalorder %v73_v14, 96  ;;  %v2138_v62 = vsel %vm1628_vm13, 1, %v1935_v56  ;;  %s1559_s18 = sshll.u32 %s1937_s17, 4  ;;  %s1560_s18 = int_to_ptr.vmem [resolvable:$true] %s1559_s18 }
   0xd   :  { %371 = vmatpush.msrb.mxu3 %v2033_v3  ;;  %293 = vmatpush.msrb.mxu2 %v2026_v2  ;;  %vm76_vm4 = vmand %vm74_vm2, %vm75_vm3  ;;  %s1938_s10 = smov [#allocation10]   ;;  %s1941_s24 = smov [#allocation11]  }
   0xe   :  { %871 = vmatpush.msrb.mxu1 %v2021_v1  ;;  %794 = vmatpush.msrb.mxu0 %v2026_v2  ;;  %v2110_v17 = vsel %vm76_vm4, 2.0, %v1933_v16  ;;  %s1581_s25 = sshll.u32 %s1941_s24, 4  ;;  %s1583_s29 = sshll.u32 %s2849_s12, 4  ;;  %s1582_s25 = int_to_ptr.vmem [resolvable:$true] %s1581_s25  ;;  %s1584_s29 = int_to_ptr.hbm [resolvable:$true] %s1583_s29 }
   0xf   :  { %372 = vmatpush.msrb.mxu3 %v2044_v6  ;;  %294 = vmatpush.msrb.mxu2 %v2039_v5  ;;  %v2118_v42 = vadd.f32 -1.0, %v2110_v17  ;;  %s1942_s0 = smov [#allocation13]  }
  0x10   :  { %872 = vmatpush.msrb.mxu1 %v2033_v3  ;;  %795 = vmatpush.msrb.mxu0 %v2039_v5  ;;  %s1592_s14 = sshll.u32 %s1942_s0, 4  ;;  %s1593_s14 = int_to_ptr.vmem [resolvable:$true] %s1592_s14 }
  0x11   :  { %373 = vmatpush.msrb.mxu3 %v2060_v8  ;;  %295 = vmatpush.msrb.mxu2 %v2055_v7 }
  0x12   :  { %873 = vmatpush.msrb.mxu1 %v2044_v6  ;;  %796 = vmatpush.msrb.mxu0 %v2055_v7 }
  0x13   :  { %704 = vmatpush.msra.mxu3 %v2021_v1  ;;  %626 = vmatpush.msra.mxu2 %v2016_v0 }
  0x14   :  { %228 = vrot.lane.b32.xlu1 %v90_v12, %s1932_s3  ;;  %874 = vmatpush.msrb.mxu1 %v2060_v8 }
  0x15   :  { %705 = vmatpush.msra.mxu3 %v2033_v3  ;;  %627 = vmatpush.msra.mxu2 %v2026_v2 }
  0x16   :  { %1704 = vset.pattern.permute.xlu2 %v1935_v56  ;;  %1705 = vset.pattern.permute.xlu0 %v1935_v56 }
  0x17   :  { %706 = vmatpush.msra.mxu3 %v2044_v6  ;;  %628 = vmatpush.msra.mxu2 %v2039_v5 }
  0x18   :  { %1706 = vset.pattern.permute.xlu1 %v1935_v56 }
  0x19   :  { %707 = vmatpush.msra.mxu3 %v2060_v8  ;;  %629 = vmatpush.msra.mxu2 %v2055_v7 }
  0x7e   :  { %v2143_v63 = vpop.permute.xlu1 %145 }
  0x86   :  { %v2149_v13 = vpop.permute.xlu1 %228 }
  0x8e   :  { %v118_v18 = vpop.f32.mrf.mxu2 }
  0x8f   :  { %v121_v20 = vadd.f32 %v118_v18, %v96_v15  ;;  %v201_v21 = vpop.f32.mrf.mxu3 }
  0x90   :  { %v204_v23 = vadd.f32 %v1632_v19, %v201_v21 }
  0x91   :  { %v122_v22 = vmul.f32 %v121_v20, %v2110_v17 }
  0x92   :  { %v205_v25 = vmul.f32 %v204_v23, %v2110_v17 }
  0x93   :  { %v1630_v24 = vmul.f32 -1.442695, %v122_v22 }
  0x94   :  { %v1634_v26 = vmul.f32 -1.442695, %v205_v25 }
  0x95   :  { %1709 = vpow2.f32 %v1630_v24 }
  0x96   :  { %1711 = vpow2.f32 %v1634_v26 }
  0x9b   :  { %v1710_v27 = vpop.eup %1709 }
  0x9c   :  { %v126_v28 = vadd.f32 1.0, %v1710_v27  ;;  %v1712_v29 = vpop.eup %1711 }
  0x9d   :  { %v209_v30 = vadd.f32 1.0, %v1712_v29 }
  0x9e   :  { %1713 = vrcp.f32 %v126_v28  ;;  %v138_v36 = vand.u32 2147483648, %v126_v28  ;;  %v136_v39 = vand.u32 2147483647, %v126_v28  ;;  %vm132_vm6 = vweird.f32 %v126_v28 }
  0x9f   :  { %1715 = vrcp.f32 %v209_v30  ;;  %vm215_vm7 = vweird.f32 %v209_v30  ;;  %v221_v44 = vand.u32 2147483648, %v209_v30  ;;  %v219_v47 = vand.u32 2147483647, %v209_v30 }
  0xa0   :  { %v139_v43 = vor.u32 1.1754944e-38, %v138_v36  ;;  %vm137_vm10 = vcmp.eq.f32.partialorder %v136_v39, 8.507059e+37 }
  0xa1   :  { %v222_v51 = vor.u32 1.1754944e-38, %v221_v44  ;;  %vm220_vm12 = vcmp.eq.f32.partialorder %v219_v47, 8.507059e+37 }
  0xa4   :  { %v1714_v31 = vpop.eup %1713 }
  0xa5   :  { %v128_v32 = vmul.f32 %v1714_v31, %v126_v28  ;;  %v1716_v33 = vpop.eup %1715  ;;  %vm133_vm5 = vweird.f32 %v1714_v31 }
  0xa6   :  { %v211_v35 = vmul.f32 %v1716_v33, %v209_v30  ;;  %vm216_vm8 = vweird.f32 %v1716_v33  ;;  %vm134_vm9 = vmor %vm132_vm6, %vm133_vm5 }
  0xa7   :  { %v129_v34 = vsub.f32 1.0, %v128_v32  ;;  %vm217_vm11 = vmor %vm215_vm7, %vm216_vm8  ;;  %v1640_v32 = vld [vmem:[%s2839_s2 + $0xc] sm:$0x3] }
  0xa8   :  { %v212_v38 = vsub.f32 1.0, %v211_v35 }
  0xa9   :  { %v130_v37 = vmul.f32 %v1714_v31, %v129_v34 }
  0xaa   :  { %v213_v40 = vmul.f32 %v1716_v33, %v212_v38 }
  0xab   :  { %v131_v41 = vadd.f32 %v1714_v31, %v130_v37 }
  0xac   :  { %v214_v46 = vadd.f32 %v1716_v33, %v213_v40 }
  0xad   :  { %v135_v45 = vsel %vm134_vm9, %v1714_v31, %v131_v41 }
  0xae   :  { %v140_v48 = vsel %vm137_vm10, %v139_v43, %v135_v45  ;;  %v218_v50 = vsel %vm217_vm11, %v1716_v33, %v214_v46  ;;  %v1636_v46 = vld [vmem:[%s2838_s1 + $0x2] sm:$0x3]  ;;  %vm1635_vm11 = vcmp.gt.s32.totalorder %v2133_v61, 1 }
  0xaf   :  { %v142_v49 = vmul.f32 %v140_v48, %v2110_v17  ;;  %v223_v53 = vsel %vm220_vm12, %v222_v51, %v218_v50  ;;  %vm1639_vm12 = vcmp.gt.s32.totalorder %v2133_v61, 6 }
  0xb0   :  { %v225_v54 = vmul.f32 %v223_v53, %v2110_v17 }
  0xb1   :  { %v143_v52 = vsub.f32 %v142_v49, %v2118_v42 }
  0xb2   :  { %v226_v55 = vsub.f32 %v225_v54, %v2118_v42 }
  0xb3   :  { %150 = vrot.lane.b32.xlu0 %v143_v52, %s1934_s27  ;;  %v148_v4 = vmul.f32 %v2143_v63, %v143_v52 }
  0xb4   :  { %v231_v14 = vmul.f32 %v2149_v13, %v226_v55 }
  0xbb   :  { %233 = vrot.lane.b32.xlu0 %v226_v55, %s1934_s27 }
 0x125   :  { %v151_v57 = vpop.permute.xlu0 %150 }
 0x126   :  { %v153_v58 = vmul.f32 %v151_v57, %v143_v52 }
 0x128   :  { %155 = vrot.lane.b32.xlu2 %v153_v58, %s1932_s3 }
 0x12d   :  { %v234_v59 = vpop.permute.xlu0 %233 }
 0x12e   :  { %v236_v60 = vmul.f32 %v234_v59, %v226_v55 }
 0x130   :  { %238 = vrot.lane.b32.xlu2 %v236_v60, %s1932_s3 }
 0x138   :  { %167 = vperm.xlu2 %1704, %v2138_v62  }
 0x140   :  { %254 = vrot.lane.b32.xlu2 %v2078_v11, %s1936_s30  ;;  %v2158_v11 = vsel %vm1631_vm14, 1, %v1935_v56 }
 0x182   :  { %v156_v10 = vpop.permute.xlu2 %155 }
 0x183   :  { %v2146_v12 = vadd.f32 %v156_v10, %v148_v4 }
 0x185   :  { %1717 = vtanh.f32 %v2146_v12 }
 0x18a   :  { %v239_v15 = vpop.permute.xlu2 %238 }
 0x18b   :  { %v1718_v16 = vpop.eup %1717  ;;  %v2152_v18 = vadd.f32 %v239_v15, %v231_v14 }
 0x18c   :  { %161 = vrot.lane.b32.xlu0 %v1718_v16, %s1934_s27 }
 0x18d   :  { %1719 = vtanh.f32 %v2152_v18 }
 0x192   :  { %v2164_v20 = vpop.permute.xlu2 %167 }
 0x193   :  { %v1720_v19 = vpop.eup %1719  ;;  %vm169_vm2 = vcmp.eq.s32.totalorder %v2164_v20, 1 }
 0x194   :  { %244 = vrot.lane.b32.xlu1 %v1720_v19, %s1934_s27  ;;  %250 = vperm.xlu0 %1705, %v2158_v11  }
 0x19a   :  { %v255_v22 = vpop.permute.xlu2 %254 }
 0x19c   :  { %171 = vrot.lane.b32.xlu1 %v2071_v9, %s1936_s30 }
 0x1fe   :  { %v162_v21 = vpop.permute.xlu0 %161 }
 0x1ff   :  { %v2179_v9 = vmul.f32 %v162_v21, %v143_v52 }
 0x206   :  { %v245_v23 = vpop.permute.xlu1 %244  ;;  %v2166_v24 = vpop.permute.xlu0 %250 }
 0x207   :  { %v247_v25 = vmul.f32 %v245_v23, %v226_v55  ;;  %vm252_vm15 = vcmp.eq.s32.totalorder %v2166_v24, 1  ;;  %v2244_v24 = vsel %vm1639_vm12, 1, %v1935_v56 }
 0x209   :  { %v2171_v26 = vsel %vm252_vm15, %v247_v25, %v255_v22  ;;  %v2175_v27 = vsel %vm252_vm15, %v247_v25, 0.0 }
 0x20a   :  { %354 = vrot.lane.b32.xlu2 %v2171_v26, %s1932_s3 }
 0x20e   :  { %v172_v28 = vpop.permute.xlu1 %171 }
 0x20f   :  { %v2185_v29 = vsel %vm169_vm2, %v2179_v9, %v172_v28 }
 0x210   :  { %276 = vrot.lane.b32.xlu1 %v2185_v29, %s1932_s3 }
 0x264   :  { %v355_v30 = vpop.permute.xlu2 %354 }
 0x265   :  { %1641 = vmatmul.msk.f32.vlgmr.msrb.gmra.mxu3 %vm97_vm1, %v355_v30 }
 0x266   :  { %1038 = vmatpush.msrb.mxu3 %v2021_v1 }
 0x268   :  { %1039 = vmatpush.msrb.mxu3 %v2033_v3 }
 0x26a   :  { %1040 = vmatpush.msrb.mxu3 %v2044_v6 }
 0x26c   :  { %1041 = vmatpush.msrb.mxu3 %v2060_v8 }
 0x282   :  { %v277_v31 = vpop.permute.xlu1 %276 }
 0x283   :  { %1637 = vmatmul.msk.f32.vlgmr.msrb.gmra.mxu2 %vm97_vm1, %v277_v31 }
 0x284   :  { %960 = vmatpush.msrb.mxu2 %v2016_v0 }
 0x286   :  { %961 = vmatpush.msrb.mxu2 %v2026_v2 }
 0x288   :  { %962 = vmatpush.msrb.mxu2 %v2039_v5 }
 0x28a   :  { %963 = vmatpush.msrb.mxu2 %v2055_v7 }
 0x2e8   :  { %v375_v33 = vpop.f32.mrf.mxu3 }
 0x2e9   :  { %v378_v34 = vadd.f32 %v1640_v32, %v375_v33  ;;  %v2216_v32 = vsel %vm1635_vm11, 1, %v1935_v56  ;;  %vm1647_vm11 = vcmp.gt.s32.totalorder %v2133_v61, 5 }
 0x2eb   :  { %v379_v35 = vmul.f32 %v378_v34, %v2110_v17 }
 0x2ed   :  { %v1642_v36 = vmul.f32 -1.442695, %v379_v35  ;;  %v2224_v35 = vsel %vm252_vm15, %v2152_v18, %v2149_v13 }
 0x2ef   :  { %1721 = vpow2.f32 %v1642_v36 }
 0x2f5   :  { %v1722_v37 = vpop.eup %1721 }
 0x2f6   :  { %v383_v38 = vadd.f32 1.0, %v1722_v37 }
 0x2f8   :  { %1723 = vrcp.f32 %v383_v38  ;;  %v395_v43 = vand.u32 2147483648, %v383_v38  ;;  %v393_v45 = vand.u32 2147483647, %v383_v38  ;;  %vm389_vm4 = vweird.f32 %v383_v38 }
 0x2fa   :  { %v396_v49 = vor.u32 1.1754944e-38, %v395_v43  ;;  %vm394_vm6 = vcmp.eq.f32.partialorder %v393_v45, 8.507059e+37 }
 0x2fe   :  { %v1724_v39 = vpop.eup %1723 }
 0x2ff   :  { %v385_v40 = vmul.f32 %v1724_v39, %v383_v38  ;;  %vm390_vm3 = vweird.f32 %v1724_v39 }
 0x300   :  { %vm391_vm5 = vmor %vm389_vm4, %vm390_vm3 }
 0x301   :  { %v386_v41 = vsub.f32 1.0, %v385_v40 }
 0x303   :  { %v387_v44 = vmul.f32 %v1724_v39, %v386_v41 }
 0x305   :  { %v388_v47 = vadd.f32 %v1724_v39, %v387_v44 }
 0x306   :  { %v297_v48 = vpop.f32.mrf.mxu2 }
 0x307   :  { %v300_v50 = vadd.f32 %v1636_v46, %v297_v48  ;;  %v392_v51 = vsel %vm391_vm5, %v1724_v39, %v388_v47  ;;  %v2234_v39 = vsel %vm169_vm2, %v2146_v12, %v2143_v63 }
 0x308   :  { %v397_v52 = vsel %vm394_vm6, %v396_v49, %v392_v51  ;;  %v1644_v51 = vld [vmem:[%s2838_s1 + $0x4] sm:$0x3] }
 0x309   :  { %v301_v53 = vmul.f32 %v300_v50, %v2110_v17  ;;  %v399_v54 = vmul.f32 %v397_v52, %v2110_v17 }
 0x30b   :  { %v1638_v55 = vmul.f32 -1.442695, %v301_v53  ;;  %v400_v57 = vsub.f32 %v399_v54, %v2118_v42 }
 0x30d   :  { %1725 = vpow2.f32 %v1638_v55  ;;  %403 = vrot.lane.b32.xlu1 %v400_v57, %s1934_s27  ;;  %v401_v36 = vmul.f32 %v400_v57, %v2224_v35 }
 0x313   :  { %v1726_v58 = vpop.eup %1725 }
 0x314   :  { %v305_v59 = vadd.f32 1.0, %v1726_v58 }
 0x316   :  { %1727 = vrcp.f32 %v305_v59  ;;  %v317_v14 = vand.u32 2147483648, %v305_v59  ;;  %v315_v16 = vand.u32 2147483647, %v305_v59  ;;  %vm311_vm8 = vweird.f32 %v305_v59 }
 0x318   :  { %v318_v21 = vor.u32 1.1754944e-38, %v317_v14  ;;  %vm316_vm10 = vcmp.eq.f32.partialorder %v315_v16, 8.507059e+37  ;;  %v1648_v16 = vld [vmem:[%s2839_s2 + $0xa] sm:$0x3] }
 0x31c   :  { %v1728_v60 = vpop.eup %1727 }
 0x31d   :  { %v307_v4 = vmul.f32 %v1728_v60, %v305_v59  ;;  %vm312_vm7 = vweird.f32 %v1728_v60 }
 0x31e   :  { %vm313_vm9 = vmor %vm311_vm8, %vm312_vm7 }
 0x31f   :  { %v308_v10 = vsub.f32 1.0, %v307_v4 }
 0x321   :  { %v309_v15 = vmul.f32 %v1728_v60, %v308_v10 }
 0x323   :  { %v310_v19 = vadd.f32 %v1728_v60, %v309_v15 }
 0x325   :  { %v314_v22 = vsel %vm313_vm9, %v1728_v60, %v310_v19 }
 0x326   :  { %v319_v23 = vsel %vm316_vm10, %v318_v21, %v314_v22  ;;  %vm1643_vm10 = vcmp.gt.s32.totalorder %v2133_v61, 2 }
 0x327   :  { %v321_v25 = vmul.f32 %v319_v23, %v2110_v17 }
 0x329   :  { %v322_v28 = vsub.f32 %v321_v25, %v2118_v42 }
 0x32b   :  { %325 = vrot.lane.b32.xlu0 %v322_v28, %s1934_s27  ;;  %v323_v40 = vmul.f32 %v322_v28, %v2234_v39 }
 0x37f   :  { %v404_v30 = vpop.permute.xlu1 %403 }
 0x380   :  { %v406_v31 = vmul.f32 %v404_v30, %v400_v57 }
 0x382   :  { %408 = vrot.lane.b32.xlu0 %v406_v31, %s1932_s3 }
 0x38a   :  { %342 = vperm.xlu0 %1705, %v2216_v32  }
 0x39d   :  { %v326_v33 = vpop.permute.xlu0 %325 }
 0x39e   :  { %v328_v34 = vmul.f32 %v326_v33, %v322_v28 }
 0x3a0   :  { %330 = vrot.lane.b32.xlu2 %v328_v34, %s1932_s3 }
 0x3f4   :  { %v409_v37 = vpop.permute.xlu0 %408 }
 0x3f5   :  { %v2227_v38 = vadd.f32 %v409_v37, %v401_v36 }
 0x3f7   :  { %1729 = vtanh.f32 %v2227_v38 }
 0x3fa   :  { %v331_v41 = vpop.permute.xlu2 %330 }
 0x3fb   :  { %v2237_v43 = vadd.f32 %v331_v41, %v323_v40 }
 0x3fc   :  { %v2247_v63 = vpop.permute.xlu0 %342 }
 0x3fd   :  { %v1730_v13 = vpop.eup %1729  ;;  %1731 = vtanh.f32 %v2237_v43  ;;  %vm344_vm13 = vcmp.eq.s32.totalorder %v2247_v63, 1  ;;  %v1511_v63 = vld [vmem:[%s2844_s7 + $0x30] sm:$0xff] }
 0x3fe   :  { %414 = vrot.lane.b32.xlu2 %v1730_v13, %s1934_s27 }
 0x403   :  { %v1732_v18 = vpop.eup %1731 }
 0x404   :  { %336 = vrot.lane.b32.xlu1 %v1732_v18, %s1934_s27 }
 0x40c   :  { %420 = vperm.xlu1 %1706, %v2244_v24  }
 0x458   :  { %v415_v46 = vpop.permute.xlu2 %414 }
 0x459   :  { %v417_v47 = vmul.f32 %v415_v46, %v400_v57 }
 0x476   :  { %v337_v12 = vpop.permute.xlu1 %336 }
 0x477   :  { %v2249_v44 = vmul.f32 %v337_v12, %v322_v28 }
 0x479   :  { %v2256_v45 = vsel %vm344_vm13, %v2249_v44, %v2185_v29 }
 0x47a   :  { %443 = vrot.lane.b32.xlu2 %v2256_v45, %s1932_s3 }
 0x47e   :  { %v2260_v48 = vpop.permute.xlu1 %420 }
 0x47f   :  { %vm422_vm14 = vcmp.eq.s32.totalorder %v2260_v48, 1 }
 0x480   :  { %v2266_v49 = vsel %vm422_vm14, %v417_v47, %v2171_v26  ;;  %v2270_v50 = vsel %vm422_vm14, %v417_v47, 0.0 }
 0x481   :  { %521 = vrot.lane.b32.xlu0 %v2266_v49, %s1932_s3 }
 0x4d4   :  { %v444_v29 = vpop.permute.xlu2 %443 }
 0x4d5   :  { %1645 = vmatmul.msk.f32.vlgmr.msra.gmra.mxu0 %vm97_vm1, %v444_v29 }
 0x4d6   :  { %1127 = vmatpush.msra.mxu0 %v2016_v0 }
 0x4d8   :  { %1128 = vmatpush.msra.mxu0 %v2026_v2 }
 0x4da   :  { %1129 = vmatpush.msra.mxu0 %v2039_v5 }
 0x4dc   :  { %1130 = vmatpush.msra.mxu0 %v2055_v7 }
 0x4f3   :  { %v522_v26 = vpop.permute.xlu0 %521 }
 0x4f4   :  { %1649 = vmatmul.msk.f32.vlgmr.msra.gmra.mxu1 %vm97_vm1, %v522_v26 }
 0x4f5   :  { %1205 = vmatpush.msra.mxu1 %v2021_v1 }
 0x4f7   :  { %1206 = vmatpush.msra.mxu1 %v2033_v3 }
 0x4f9   :  { %1207 = vmatpush.msra.mxu1 %v2044_v6 }
 0x4fb   :  { %1208 = vmatpush.msra.mxu1 %v2060_v8 }
 0x552   :  { %v464_v52 = vpop.f32.mrf.mxu0 }
 0x553   :  { %v467_v53 = vadd.f32 %v1644_v51, %v464_v52 }
 0x555   :  { %v468_v54 = vmul.f32 %v467_v53, %v2110_v17 }
 0x557   :  { %v1646_v55 = vmul.f32 -1.442695, %v468_v54 }
 0x559   :  { %1733 = vpow2.f32 %v1646_v55 }
 0x55f   :  { %v1734_v57 = vpop.eup %1733 }
 0x560   :  { %v472_v58 = vadd.f32 1.0, %v1734_v57 }
 0x562   :  { %1735 = vrcp.f32 %v472_v58  ;;  %v484_v10 = vand.u32 2147483648, %v472_v58  ;;  %v482_v15 = vand.u32 2147483647, %v472_v58  ;;  %vm478_vm3 = vweird.f32 %v472_v58 }
 0x564   :  { %v485_v21 = vor.u32 1.1754944e-38, %v484_v10  ;;  %vm483_vm5 = vcmp.eq.f32.partialorder %v482_v15, 8.507059e+37  ;;  %v2319_v15 = vsel %vm422_vm14, %v2227_v38, %v2224_v35 }
 0x568   :  { %v1736_v59 = vpop.eup %1735 }
 0x569   :  { %v474_v60 = vmul.f32 %v1736_v59, %v472_v58  ;;  %vm479_vm15 = vweird.f32 %v1736_v59 }
 0x56a   :  { %vm480_vm4 = vmor %vm478_vm3, %vm479_vm15 }
 0x56b   :  { %v475_v4 = vsub.f32 1.0, %v474_v60  ;;  %v2309_v60 = vsel %vm344_vm13, %v2237_v43, %v2234_v39  ;;  %v2328_v43 = vsel %vm1647_vm11, 1, %v1935_v56  ;;  %vm1655_vm11 = vcmp.gt.s32.totalorder %v2133_v61, 4 }
 0x56d   :  { %v476_v14 = vmul.f32 %v1736_v59, %v475_v4 }
 0x56f   :  { %v477_v19 = vadd.f32 %v1736_v59, %v476_v14 }
 0x571   :  { %v542_v22 = vpop.f32.mrf.mxu1  ;;  %v481_v23 = vsel %vm480_vm4, %v1736_v59, %v477_v19  ;;  %v2302_v59 = vsel %vm1643_vm10, 1, %v1935_v56  ;;  %vm1651_vm10 = vcmp.gt.s32.totalorder %v2133_v61, 3 }
 0x572   :  { %v545_v25 = vadd.f32 %v1648_v16, %v542_v22  ;;  %v486_v28 = vsel %vm483_vm5, %v485_v21, %v481_v23 }
 0x573   :  { %v488_v30 = vmul.f32 %v486_v28, %v2110_v17 }
 0x574   :  { %v546_v31 = vmul.f32 %v545_v25, %v2110_v17 }
 0x575   :  { %v489_v33 = vsub.f32 %v488_v30, %v2118_v42 }
 0x576   :  { %v1650_v34 = vmul.f32 -1.442695, %v546_v31 }
 0x577   :  { %492 = vrot.lane.b32.xlu1 %v489_v33, %s1934_s27  ;;  %v490_v4 = vmul.f32 %v489_v33, %v2309_v60 }
 0x578   :  { %1737 = vpow2.f32 %v1650_v34 }
 0x57e   :  { %v1738_v36 = vpop.eup %1737 }
 0x57f   :  { %v550_v37 = vadd.f32 1.0, %v1738_v36 }
 0x581   :  { %1739 = vrcp.f32 %v550_v37  ;;  %v562_v18 = vand.u32 2147483648, %v550_v37  ;;  %v560_v46 = vand.u32 2147483647, %v550_v37  ;;  %vm556_vm7 = vweird.f32 %v550_v37 }
 0x583   :  { %v563_v29 = vor.u32 1.1754944e-38, %v562_v18  ;;  %vm561_vm9 = vcmp.eq.f32.partialorder %v560_v46, 8.507059e+37 }
 0x587   :  { %v1740_v40 = vpop.eup %1739 }
 0x588   :  { %v552_v41 = vmul.f32 %v1740_v40, %v550_v37  ;;  %vm557_vm6 = vweird.f32 %v1740_v40 }
 0x589   :  { %vm558_vm8 = vmor %vm556_vm7, %vm557_vm6 }
 0x58a   :  { %v553_v13 = vsub.f32 1.0, %v552_v41 }
 0x58c   :  { %v554_v12 = vmul.f32 %v1740_v40, %v553_v13  ;;  %v1656_v13 = vld [vmem:[%s2839_s2 + $0x8] sm:$0x3] }
 0x58e   :  { %v555_v47 = vadd.f32 %v1740_v40, %v554_v12 }
 0x590   :  { %v559_v26 = vsel %vm558_vm8, %v1740_v40, %v555_v47 }
 0x591   :  { %v564_v51 = vsel %vm561_vm9, %v563_v29, %v559_v26 }
 0x592   :  { %v566_v52 = vmul.f32 %v564_v51, %v2110_v17 }
 0x594   :  { %v567_v53 = vsub.f32 %v566_v52, %v2118_v42 }
 0x596   :  { %570 = vrot.lane.b32.xlu2 %v567_v53, %s1934_s27  ;;  %v568_v16 = vmul.f32 %v567_v53, %v2319_v15 }
 0x5e9   :  { %v493_v54 = vpop.permute.xlu1 %492 }
 0x5ea   :  { %v495_v55 = vmul.f32 %v493_v54, %v489_v33 }
 0x5ec   :  { %497 = vrot.lane.b32.xlu0 %v495_v55, %s1932_s3 }
 0x5f0   :  { %v571_v57 = vpop.permute.xlu2 %570 }
 0x5f1   :  { %v573_v58 = vmul.f32 %v571_v57, %v567_v53 }
 0x5f3   :  { %575 = vrot.lane.b32.xlu1 %v573_v58, %s1932_s3 }
 0x5fb   :  { %509 = vperm.xlu1 %1706, %v2302_v59  }
 0x65e   :  { %v498_v10 = vpop.permute.xlu0 %497 }
 0x65f   :  { %v2312_v14 = vadd.f32 %v498_v10, %v490_v4 }
 0x661   :  { %1741 = vtanh.f32 %v2312_v14 }
 0x665   :  { %v576_v19 = vpop.permute.xlu1 %575 }
 0x666   :  { %v2322_v21 = vadd.f32 %v576_v19, %v568_v16 }
 0x667   :  { %v1742_v39 = vpop.eup %1741 }
 0x668   :  { %1743 = vtanh.f32 %v2322_v21  ;;  %503 = vrot.lane.b32.xlu2 %v1742_v39, %s1934_s27 }
 0x66d   :  { %v2332_v35 = vpop.permute.xlu1 %509 }
 0x66e   :  { %v1744_v22 = vpop.eup %1743  ;;  %vm511_vm12 = vcmp.eq.s32.totalorder %v2332_v35, 1 }
 0x66f   :  { %581 = vrot.lane.b32.xlu0 %v1744_v22, %s1934_s27 }
 0x670   :  { %587 = vperm.xlu2 %1704, %v2328_v43  }
 0x6c2   :  { %v504_v38 = vpop.permute.xlu2 %503 }
 0x6c3   :  { %v2334_v48 = vmul.f32 %v504_v38, %v489_v33 }
 0x6c5   :  { %v2341_v23 = vsel %vm511_vm12, %v2334_v48, %v2256_v45 }
 0x6c6   :  { %610 = vrot.lane.b32.xlu0 %v2341_v23, %s1932_s3 }
 0x6ca   :  { %v2345_v25 = vpop.permute.xlu2 %587 }
 0x6cb   :  { %vm589_vm14 = vcmp.eq.s32.totalorder %v2345_v25, 1 }
 0x6e1   :  { %v582_v28 = vpop.permute.xlu0 %581 }
 0x6e2   :  { %v584_v30 = vmul.f32 %v582_v28, %v567_v53 }
 0x6e4   :  { %v2351_v31 = vsel %vm589_vm14, %v584_v30, %v2266_v49  ;;  %v2355_v33 = vsel %vm589_vm14, %v584_v30, 0.0 }
 0x6e5   :  { %688 = vrot.lane.b32.xlu1 %v2351_v31, %s1932_s3 }
 0x738   :  { %v611_v45 = vpop.permute.xlu0 %610 }
 0x739   :  { %1653 = vmatmul.msk.f32.vlgmr.msra.gmra.mxu2 %vm97_vm1, %v611_v45 }
 0x73a   :  { %1294 = vmatpush.msra.mxu2 %v2016_v0  ;;  %v1652_v0 = vld [vmem:[%s2838_s1 + $0x6] sm:$0x3] }
 0x73c   :  { %1295 = vmatpush.msra.mxu2 %v2026_v2 }
 0x73e   :  { %1296 = vmatpush.msra.mxu2 %v2039_v5 }
 0x740   :  { %1297 = vmatpush.msra.mxu2 %v2055_v7 }
 0x757   :  { %v689_v49 = vpop.permute.xlu1 %688 }
 0x758   :  { %1657 = vmatmul.msk.f32.vlgmr.msra.gmra.mxu3 %vm97_vm1, %v689_v49 }
 0x759   :  { %1370 = vmatpush.msra.mxu3 %v2021_v1 }
 0x75b   :  { %1371 = vmatpush.msra.mxu3 %v2033_v3 }
 0x75d   :  { %1372 = vmatpush.msra.mxu3 %v2044_v6 }
 0x75f   :  { %1373 = vmatpush.msra.mxu3 %v2060_v8 }
 0x7bc   :  { %v631_v2 = vpop.f32.mrf.mxu2 }
 0x7bd   :  { %v634_v34 = vadd.f32 %v1652_v0, %v631_v2 }
 0x7bf   :  { %v635_v5 = vmul.f32 %v634_v34, %v2110_v17 }
 0x7c1   :  { %v1654_v7 = vmul.f32 -1.442695, %v635_v5 }
 0x7c3   :  { %1745 = vpow2.f32 %v1654_v7  ;;  %v2387_v7 = vsel %vm1651_vm10, 1, %v1935_v56 }
 0x7c9   :  { %v1746_v36 = vpop.eup %1745 }
 0x7ca   :  { %v639_v37 = vadd.f32 1.0, %v1746_v36  ;;  %v2394_v36 = vsel %vm511_vm12, %v2312_v14, %v2309_v60  ;;  %v2410_v60 = vsel %vm589_vm14, %v2322_v21, %v2319_v15 }
 0x7cc   :  { %1747 = vrcp.f32 %v639_v37  ;;  %v651_v41 = vand.u32 2147483648, %v639_v37  ;;  %v649_v8 = vand.u32 2147483647, %v639_v37  ;;  %vm645_vm3 = vweird.f32 %v639_v37 }
 0x7ce   :  { %v652_v12 = vor.u32 1.1754944e-38, %v651_v41  ;;  %vm650_vm5 = vcmp.eq.f32.partialorder %v649_v8, 8.507059e+37  ;;  %v2403_v41 = vsel %vm1655_vm11, 1, %v1935_v56 }
 0x7d2   :  { %v1748_v1 = vpop.eup %1747 }
 0x7d3   :  { %v641_v40 = vmul.f32 %v1748_v1, %v639_v37  ;;  %vm646_vm15 = vweird.f32 %v1748_v1 }
 0x7d4   :  { %vm647_vm4 = vmor %vm645_vm3, %vm646_vm15 }
 0x7d5   :  { %v642_v3 = vsub.f32 1.0, %v641_v40 }
 0x7d7   :  { %v643_v6 = vmul.f32 %v1748_v1, %v642_v3 }
 0x7d9   :  { %v644_v18 = vadd.f32 %v1748_v1, %v643_v6 }
 0x7db   :  { %v709_v46 = vpop.f32.mrf.mxu3  ;;  %v648_v47 = vsel %vm647_vm4, %v1748_v1, %v644_v18 }
 0x7dc   :  { %v712_v29 = vadd.f32 %v1656_v13, %v709_v46  ;;  %v653_v26 = vsel %vm650_vm5, %v652_v12, %v648_v47 }
 0x7dd   :  { %v655_v51 = vmul.f32 %v653_v26, %v2110_v17  ;;  %v1660_v26 = vld [vmem:[%s2838_s1 + $0x8] sm:$0x3] }
 0x7de   :  { %v713_v52 = vmul.f32 %v712_v29, %v2110_v17 }
 0x7df   :  { %v656_v53 = vsub.f32 %v655_v51, %v2118_v42 }
 0x7e0   :  { %v1658_v54 = vmul.f32 -1.442695, %v713_v52 }
 0x7e1   :  { %659 = vrot.lane.b32.xlu2 %v656_v53, %s1934_s27  ;;  %v657_v37 = vmul.f32 %v656_v53, %v2394_v36 }
 0x7e2   :  { %1749 = vpow2.f32 %v1658_v54  ;;  %v1664_v54 = vld [vmem:[%s2839_s2 + $0x6] sm:$0x3] }
 0x7e8   :  { %v1750_v55 = vpop.eup %1749 }
 0x7e9   :  { %v717_v57 = vadd.f32 1.0, %v1750_v55 }
 0x7eb   :  { %1751 = vrcp.f32 %v717_v57  ;;  %v729_v16 = vand.u32 2147483648, %v717_v57  ;;  %v727_v39 = vand.u32 2147483647, %v717_v57  ;;  %vm723_vm7 = vweird.f32 %v717_v57 }
 0x7ed   :  { %v730_v38 = vor.u32 1.1754944e-38, %v729_v16  ;;  %vm728_vm9 = vcmp.eq.f32.partialorder %v727_v39, 8.507059e+37 }
 0x7f1   :  { %v1752_v58 = vpop.eup %1751 }
 0x7f2   :  { %v719_v4 = vmul.f32 %v1752_v58, %v717_v57  ;;  %vm724_vm6 = vweird.f32 %v1752_v58 }
 0x7f3   :  { %vm725_vm8 = vmor %vm723_vm7, %vm724_vm6 }
 0x7f4   :  { %v720_v10 = vsub.f32 1.0, %v719_v4 }
 0x7f6   :  { %v721_v19 = vmul.f32 %v1752_v58, %v720_v10 }
 0x7f8   :  { %v722_v22 = vadd.f32 %v1752_v58, %v721_v19 }
 0x7fa   :  { %v726_v28 = vsel %vm725_vm8, %v1752_v58, %v722_v22 }
 0x7fb   :  { %v731_v30 = vsel %vm728_vm9, %v730_v38, %v726_v28 }
 0x7fc   :  { %v733_v45 = vmul.f32 %v731_v30, %v2110_v17 }
 0x7fe   :  { %v734_v49 = vsub.f32 %v733_v45, %v2118_v42 }
 0x800   :  { %737 = vrot.lane.b32.xlu0 %v734_v49, %s1934_s27  ;;  %v735_v14 = vmul.f32 %v734_v49, %v2410_v60 }
 0x83b   :  { %v660_v0 = vpop.permute.xlu2 %659 }
 0x83c   :  { %v662_v2 = vmul.f32 %v660_v0, %v656_v53 }
 0x83e   :  { %664 = vrot.lane.b32.xlu1 %v662_v2, %s1932_s3 }
 0x872   :  { %v738_v34 = vpop.permute.xlu0 %737 }
 0x873   :  { %v740_v5 = vmul.f32 %v738_v34, %v734_v49 }
 0x875   :  { %742 = vrot.lane.b32.xlu2 %v740_v5, %s1932_s3 }
 0x87d   :  { %676 = vperm.xlu2 %1704, %v2387_v7  }
 0x8b0   :  { %v665_v1 = vpop.permute.xlu1 %664 }
 0x8b1   :  { %v2397_v40 = vadd.f32 %v665_v1, %v657_v37 }
 0x8b3   :  { %1753 = vtanh.f32 %v2397_v40 }
 0x8b9   :  { %v1754_v3 = vpop.eup %1753 }
 0x8ba   :  { %670 = vrot.lane.b32.xlu0 %v1754_v3, %s1934_s27 }
 0x8c2   :  { %754 = vperm.xlu0 %1705, %v2403_v41  }
 0x8cf   :  { %v743_v6 = vpop.permute.xlu2 %742 }
 0x8d0   :  { %v2413_v8 = vadd.f32 %v743_v6, %v735_v14 }
 0x8d2   :  { %1755 = vtanh.f32 %v2413_v8 }
 0x8d7   :  { %v2417_v56 = vpop.permute.xlu2 %676 }
 0x8d8   :  { %v1756_v13 = vpop.eup %1755  ;;  %vm678_vm15 = vcmp.eq.s32.totalorder %v2417_v56, 1 }
 0x8d9   :  { %748 = vrot.lane.b32.xlu1 %v1756_v13, %s1934_s27 }
 0x92c   :  { %v671_v61 = vpop.permute.xlu0 %670 }
 0x92d   :  { %v2419_v18 = vmul.f32 %v671_v61, %v656_v53 }
 0x92f   :  { %v2426_v15 = vsel %vm678_vm15, %v2419_v18, %v2341_v23  ;;  %v681_v20 = vsel %vm678_vm15, %v2419_v18, 0.0  ;;  %v1475_v18 = vld [vmem:[%s2842_s5 + $0x38] sm:$0xff] }
 0x930   :  { %777 = vrot.lane.b32.xlu1 %v2426_v15, %s1932_s3 }
 0x934   :  { %v2430_v21 = vpop.permute.xlu0 %754 }
 0x935   :  { %vm756_vm14 = vcmp.eq.s32.totalorder %v2430_v21, 1 }
 0x94b   :  { %v749_v25 = vpop.permute.xlu1 %748 }
 0x94c   :  { %v751_v12 = vmul.f32 %v749_v25, %v734_v49 }
 0x94e   :  { %v2436_v46 = vsel %vm756_vm14, %v751_v12, %v2351_v31  ;;  %v2440_v47 = vsel %vm756_vm14, %v751_v12, 0.0 }
 0x94f   :  { %855 = vrot.lane.b32.xlu2 %v2436_v46, %s1932_s3 }
 0x9a2   :  { %v778_v23 = vpop.permute.xlu1 %777 }
 0x9a3   :  { %1661 = vmatmul.msk.f32.vlgmr.msrb.gmra.mxu0 %vm97_vm1, %v778_v23 }
 0x9a4   :  { %1492 = vmatpush.msrb.mxu0 %v1475_v18 }
 0x9a9   :  { %v856_v29 = vpop.permute.xlu2 %855 }
 0x9aa   :  { %1665 = vmatmul.msk.f32.vlgmr.msrb.gmra.mxu1 %vm97_vm1, %v856_v29 }
 0xa20   :  { %v798_v51 = vpop.f32.mrf.mxu0 }
 0xa21   :  { %v801_v31 = vadd.f32 %v1660_v26, %v798_v51 }
 0xa23   :  { %v802_v52 = vmul.f32 %v801_v31, %v2110_v17 }
 0xa25   :  { %v1662_v53 = vmul.f32 -1.442695, %v802_v52 }
 0xa27   :  { %1757 = vpow2.f32 %v1662_v53  ;;  %v876_v55 = vpop.f32.mrf.mxu1 }
 0xa28   :  { %v879_v57 = vadd.f32 %v1664_v54, %v876_v55 }
 0xa2a   :  { %v880_v58 = vmul.f32 %v879_v57, %v2110_v17  ;;  %v2467_v57 = vsel %vm678_vm15, %v2397_v40, %v2394_v36 }
 0xa2c   :  { %v1666_v4 = vmul.f32 -1.442695, %v880_v58 }
 0xa2d   :  { %v1758_v10 = vpop.eup %1757 }
 0xa2e   :  { %v806_v16 = vadd.f32 1.0, %v1758_v10  ;;  %1759 = vpow2.f32 %v1666_v4 }
 0xa30   :  { %1761 = vrcp.f32 %v806_v16  ;;  %v818_v30 = vand.u32 2147483648, %v806_v16  ;;  %v816_v49 = vand.u32 2147483647, %v806_v16  ;;  %vm812_vm4 = vweird.f32 %v806_v16 }
 0xa32   :  { %v819_v5 = vor.u32 1.1754944e-38, %v818_v30  ;;  %vm817_vm6 = vcmp.eq.f32.partialorder %v816_v49, 8.507059e+37 }
 0xa34   :  { %v1760_v19 = vpop.eup %1759 }
 0xa35   :  { %v884_v39 = vadd.f32 1.0, %v1760_v19 }
 0xa36   :  { %v1762_v22 = vpop.eup %1761 }
 0xa37   :  { %v808_v38 = vmul.f32 %v1762_v22, %v806_v16  ;;  %1763 = vrcp.f32 %v884_v39  ;;  %vm813_vm3 = vweird.f32 %v1762_v22  ;;  %v896_v6 = vand.u32 2147483648, %v884_v39 }
 0xa38   :  { %vm814_vm5 = vmor %vm812_vm4, %vm813_vm3  ;;  %v894_v61 = vand.u32 2147483647, %v884_v39  ;;  %vm890_vm8 = vweird.f32 %v884_v39 }
 0xa39   :  { %v809_v28 = vsub.f32 1.0, %v808_v38  ;;  %v897_v23 = vor.u32 1.1754944e-38, %v896_v6 }
 0xa3a   :  { %vm895_vm10 = vcmp.eq.f32.partialorder %v894_v61, 8.507059e+37 }
 0xa3b   :  { %v810_v45 = vmul.f32 %v1762_v22, %v809_v28 }
 0xa3d   :  { %v1764_v0 = vpop.eup %1763  ;;  %v811_v2 = vadd.f32 %v1762_v22, %v810_v45 }
 0xa3e   :  { %v886_v34 = vmul.f32 %v1764_v0, %v884_v39  ;;  %vm891_vm7 = vweird.f32 %v1764_v0 }
 0xa3f   :  { %v815_v37 = vsel %vm814_vm5, %v1762_v22, %v811_v2  ;;  %vm892_vm9 = vmor %vm890_vm8, %vm891_vm7 }
 0xa40   :  { %v887_v1 = vsub.f32 1.0, %v886_v34  ;;  %v820_v3 = vsel %vm817_vm6, %v819_v5, %v815_v37 }
 0xa41   :  { %v822_v14 = vmul.f32 %v820_v3, %v2110_v17 }
 0xa42   :  { %v888_v13 = vmul.f32 %v1764_v0, %v887_v1 }
 0xa43   :  { %v823_v25 = vsub.f32 %v822_v14, %v2118_v42 }
 0xa44   :  { %v889_v12 = vadd.f32 %v1764_v0, %v888_v13 }
 0xa45   :  { %826 = vrot.lane.b32.xlu0 %v823_v25, %s1934_s27  ;;  %v824_v58 = vmul.f32 %v823_v25, %v2467_v57 }
 0xa46   :  { %v893_v29 = vsel %vm892_vm9, %v1764_v0, %v889_v12  ;;  %v1668_v0 = vld [vmem:[%s2838_s1 + $0xa] sm:$0x3]  ;;  %v1672_v12 = vld [vmem:[%s2839_s2 + $0x4] sm:$0x3] }
 0xa47   :  { %v898_v26 = vsel %vm895_vm10, %v897_v23, %v893_v29 }
 0xa48   :  { %v900_v51 = vmul.f32 %v898_v26, %v2110_v17 }
 0xa4a   :  { %v901_v31 = vsub.f32 %v900_v51, %v2118_v42 }
 0xa4c   :  { %904 = vrot.lane.b32.xlu1 %v901_v31, %s1934_s27 }
 0xab7   :  { %v827_v52 = vpop.permute.xlu0 %826 }
 0xab8   :  { %v829_v53 = vmul.f32 %v827_v52, %v823_v25 }
 0xaba   :  { %831 = vrot.lane.b32.xlu2 %v829_v53, %s1932_s3 }
 0xabe   :  { %v905_v54 = vpop.permute.xlu1 %904 }
 0xabf   :  { %v907_v55 = vmul.f32 %v905_v54, %v901_v31 }
 0xac1   :  { %909 = vrot.lane.b32.xlu0 %v907_v55, %s1932_s3 }
 0xac9   :  { %843 = vperm.xlu0 %1705, %v2403_v41   ;;  %v2479_v41 = vsel %vm756_vm14, %v2413_v8, %v2410_v60 }
 0xaca   :  { %v902_v36 = vmul.f32 %v901_v31, %v2479_v41 }
 0xb14   :  { %v832_v4 = vpop.permute.xlu2 %831 }
 0xb15   :  { %v2470_v10 = vadd.f32 %v832_v4, %v824_v58 }
 0xb17   :  { %1765 = vtanh.f32 %v2470_v10 }
 0xb1d   :  { %v1766_v16 = vpop.eup %1765 }
 0xb1e   :  { %837 = vrot.lane.b32.xlu1 %v1766_v16, %s1934_s27 }
 0xb26   :  { %921 = vperm.xlu1 %1706, %v2387_v7  }
 0xb33   :  { %v910_v40 = vpop.permute.xlu0 %909 }
 0xb34   :  { %v2482_v19 = vadd.f32 %v910_v40, %v902_v36 }
 0xb36   :  { %1767 = vtanh.f32 %v2482_v19 }
 0xb3b   :  { %v2486_v22 = vpop.permute.xlu0 %843 }
 0xb3c   :  { %v1768_v39 = vpop.eup %1767  ;;  %vm845_vm11 = vcmp.eq.s32.totalorder %v2486_v22, 1  ;;  %v1508_v22 = vld [vmem:[%s2844_s7 + $0x18] sm:$0xff] }
 0xb3d   :  { %915 = vrot.lane.b32.xlu2 %v1768_v39, %s1934_s27 }
 0xb90   :  { %v838_v38 = vpop.permute.xlu1 %837 }
 0xb91   :  { %v2488_v7 = vmul.f32 %v838_v38, %v823_v25 }
 0xb93   :  { %v2495_v60 = vsel %vm845_vm11, %v2488_v7, %v2426_v15 }
 0xb94   :  { %944 = vrot.lane.b32.xlu2 %v2495_v60, %s1932_s3 }
 0xb97   :  { %v916_v8 = vpop.permute.xlu2 %915 }
 0xb98   :  { %v918_v21 = vmul.f32 %v916_v8, %v901_v31  ;;  %v2499_v28 = vpop.permute.xlu1 %921 }
 0xb99   :  { %vm923_vm14 = vcmp.eq.s32.totalorder %v2499_v28, 1 }
 0xb9a   :  { %v2505_v30 = vsel %vm923_vm14, %v918_v21, %v2436_v46  ;;  %v2509_v45 = vsel %vm923_vm14, %v918_v21, 0.0 }
 0xb9b   :  { %1022 = vrot.lane.b32.xlu0 %v2505_v30, %s1932_s3 }
 0xbee   :  { %v945_v15 = vpop.permute.xlu2 %944 }
 0xbef   :  { %1669 = vmatmul.msk.f32.vlgmr.msrb.gmra.mxu2 %vm97_vm1, %v945_v15 }
 0xc0d   :  { %v1023_v49 = vpop.permute.xlu0 %1022 }
 0xc0e   :  { %1673 = vmatmul.msk.f32.vlgmr.msrb.gmra.mxu3 %vm97_vm1, %v1023_v49 }
 0xc72   :  { %v965_v2 = vpop.f32.mrf.mxu2 }
 0xc73   :  { %v968_v46 = vadd.f32 %v1668_v0, %v965_v2 }
 0xc75   :  { %v969_v34 = vmul.f32 %v968_v46, %v2110_v17 }
 0xc77   :  { %v1670_v5 = vmul.f32 -1.442695, %v969_v34 }
 0xc79   :  { %1769 = vpow2.f32 %v1670_v5 }
 0xc7f   :  { %v1770_v37 = vpop.eup %1769 }
 0xc80   :  { %v973_v1 = vadd.f32 1.0, %v1770_v37 }
 0xc82   :  { %1771 = vrcp.f32 %v973_v1  ;;  %v985_v13 = vand.u32 2147483648, %v973_v1  ;;  %v983_v25 = vand.u32 2147483647, %v973_v1  ;;  %vm979_vm4 = vweird.f32 %v973_v1 }
 0xc84   :  { %v986_v29 = vor.u32 1.1754944e-38, %v985_v13  ;;  %vm984_vm6 = vcmp.eq.f32.partialorder %v983_v25, 8.507059e+37  ;;  %v2546_v25 = vsel %vm923_vm14, %v2482_v19, %v2479_v41 }
 0xc88   :  { %v1772_v3 = vpop.eup %1771 }
 0xc89   :  { %v975_v14 = vmul.f32 %v1772_v3, %v973_v1  ;;  %vm980_vm3 = vweird.f32 %v1772_v3 }
 0xc8a   :  { %vm981_vm5 = vmor %vm979_vm4, %vm980_vm3 }
 0xc8b   :  { %v976_v6 = vsub.f32 1.0, %v975_v14  ;;  %v2536_v14 = vsel %vm845_vm11, %v2470_v10, %v2467_v57 }
 0xc8d   :  { %v977_v61 = vmul.f32 %v1772_v3, %v976_v6 }
 0xc8f   :  { %v978_v23 = vadd.f32 %v1772_v3, %v977_v61 }
 0xc91   :  { %v1043_v26 = vpop.f32.mrf.mxu3  ;;  %v982_v51 = vsel %vm981_vm5, %v1772_v3, %v978_v23 }
 0xc92   :  { %v1046_v31 = vadd.f32 %v1672_v12, %v1043_v26  ;;  %v987_v52 = vsel %vm984_vm6, %v986_v29, %v982_v51 }
 0xc93   :  { %v989_v53 = vmul.f32 %v987_v52, %v2110_v17 }
 0xc94   :  { %v1047_v54 = vmul.f32 %v1046_v31, %v2110_v17 }
 0xc95   :  { %v990_v55 = vsub.f32 %v989_v53, %v2118_v42 }
 0xc96   :  { %v1674_v58 = vmul.f32 -1.442695, %v1047_v54  ;;  %v1676_v54 = vld [vmem:[%s2838_s1 + $0xc] sm:$0x3] }
 0xc97   :  { %993 = vrot.lane.b32.xlu1 %v990_v55, %s1934_s27  ;;  %v991_v6 = vmul.f32 %v990_v55, %v2536_v14 }
 0xc98   :  { %1773 = vpow2.f32 %v1674_v58 }
 0xc9e   :  { %v1774_v4 = vpop.eup %1773 }
 0xc9f   :  { %v1051_v16 = vadd.f32 1.0, %v1774_v4 }
 0xca1   :  { %1775 = vrcp.f32 %v1051_v16  ;;  %v1063_v38 = vand.u32 2147483648, %v1051_v16  ;;  %v1061_v21 = vand.u32 2147483647, %v1051_v16  ;;  %vm1057_vm8 = vweird.f32 %v1051_v16 }
 0xca3   :  { %v1064_v49 = vor.u32 1.1754944e-38, %v1063_v38  ;;  %vm1062_vm10 = vcmp.eq.f32.partialorder %v1061_v21, 8.507059e+37 }
 0xca7   :  { %v1776_v36 = vpop.eup %1775 }
 0xca8   :  { %v1053_v40 = vmul.f32 %v1776_v36, %v1051_v16  ;;  %vm1058_vm7 = vweird.f32 %v1776_v36 }
 0xca9   :  { %vm1059_vm9 = vmor %vm1057_vm8, %vm1058_vm7 }
 0xcaa   :  { %v1054_v39 = vsub.f32 1.0, %v1053_v40 }
 0xcac   :  { %v1055_v8 = vmul.f32 %v1776_v36, %v1054_v39 }
 0xcae   :  { %v1056_v15 = vadd.f32 %v1776_v36, %v1055_v8 }
 0xcb0   :  { %v1060_v0 = vsel %vm1059_vm9, %v1776_v36, %v1056_v15 }
 0xcb1   :  { %v1065_v2 = vsel %vm1062_vm10, %v1064_v49, %v1060_v0  ;;  %v1680_v49 = vld [vmem:[%s2839_s2 + $0x2] sm:$0x3] }
 0xcb2   :  { %v1067_v46 = vmul.f32 %v1065_v2, %v2110_v17 }
 0xcb4   :  { %v1068_v34 = vsub.f32 %v1067_v46, %v2118_v42 }
 0xcb6   :  { %1071 = vrot.lane.b32.xlu2 %v1068_v34, %s1934_s27 }
 0xd09   :  { %v994_v5 = vpop.permute.xlu1 %993 }
 0xd0a   :  { %v996_v37 = vmul.f32 %v994_v5, %v990_v55 }
 0xd0c   :  { %998 = vrot.lane.b32.xlu0 %v996_v37, %s1932_s3 }
 0xd10   :  { %v1072_v1 = vpop.permute.xlu2 %1071 }
 0xd11   :  { %v1074_v3 = vmul.f32 %v1072_v1, %v1068_v34 }
 0xd13   :  { %1076 = vrot.lane.b32.xlu1 %v1074_v3, %s1932_s3 }
 0xd1b   :  { %1010 = vperm.xlu1 %1706, %v2328_v43   ;;  %v1069_v43 = vmul.f32 %v1068_v34, %v2546_v25 }
 0xd7e   :  { %v999_v13 = vpop.permute.xlu0 %998 }
 0xd7f   :  { %v2539_v61 = vadd.f32 %v999_v13, %v991_v6 }
 0xd81   :  { %1777 = vtanh.f32 %v2539_v61 }
 0xd85   :  { %v1077_v12 = vpop.permute.xlu1 %1076 }
 0xd86   :  { %v2549_v23 = vadd.f32 %v1077_v12, %v1069_v43 }
 0xd87   :  { %v1778_v57 = vpop.eup %1777 }
 0xd88   :  { %1779 = vtanh.f32 %v2549_v23  ;;  %1004 = vrot.lane.b32.xlu2 %v1778_v57, %s1934_s27 }
 0xd8d   :  { %v2555_v29 = vpop.permute.xlu1 %1010 }
 0xd8e   :  { %v1780_v10 = vpop.eup %1779  ;;  %vm2851_vm14 = vcmp.eq.s32.totalorder %v2555_v29, 1 }
 0xd8f   :  { %1082 = vrot.lane.b32.xlu0 %v1780_v10, %s1934_s27 }
 0xd90   :  { %1088 = vperm.xlu2 %1704, %v2302_v59  }
 0xde2   :  { %v1005_v28 = vpop.permute.xlu2 %1004 }
 0xde3   :  { %v2557_v41 = vmul.f32 %v1005_v28, %v990_v55 }
 0xde5   :  { %v2564_v19 = vsel %vm2851_vm14, %v2557_v41, %v2495_v60 }
 0xde6   :  { %1111 = vrot.lane.b32.xlu0 %v2564_v19, %s1932_s3 }
 0xdea   :  { %v2568_v26 = vpop.permute.xlu2 %1088 }
 0xdeb   :  { %vm1090_vm3 = vcmp.eq.s32.totalorder %v2568_v26, 1 }
 0xe01   :  { %v1083_v51 = vpop.permute.xlu0 %1082 }
 0xe02   :  { %v1085_v59 = vmul.f32 %v1083_v51, %v1068_v34 }
 0xe04   :  { %v2574_v31 = vsel %vm1090_vm3, %v1085_v59, %v2505_v30  ;;  %v2578_v52 = vsel %vm1090_vm3, %v1085_v59, 0.0 }
 0xe05   :  { %1189 = vrot.lane.b32.xlu1 %v2574_v31, %s1932_s3 }
 0xe58   :  { %v1112_v60 = vpop.permute.xlu0 %1111 }
 0xe59   :  { %1677 = vmatmul.msk.f32.vlgmr.msra.gmra.mxu0 %vm97_vm1, %v1112_v60 }
 0xe77   :  { %v1190_v53 = vpop.permute.xlu1 %1189 }
 0xe78   :  { %1681 = vmatmul.msk.f32.vlgmr.msra.gmra.mxu1 %vm97_vm1, %v1190_v53 }
 0xed6   :  { %v1132_v55 = vpop.f32.mrf.mxu0 }
 0xed7   :  { %v1135_v30 = vadd.f32 %v1676_v54, %v1132_v55 }
 0xed9   :  { %v1136_v58 = vmul.f32 %v1135_v30, %v2110_v17 }
 0xedb   :  { %v1678_v4 = vmul.f32 -1.442695, %v1136_v58 }
 0xedd   :  { %1781 = vpow2.f32 %v1678_v4 }
 0xee3   :  { %v1782_v16 = vpop.eup %1781 }
 0xee4   :  { %v1140_v36 = vadd.f32 1.0, %v1782_v16 }
 0xee6   :  { %1783 = vrcp.f32 %v1140_v36  ;;  %v1152_v8 = vand.u32 2147483648, %v1140_v36  ;;  %v1150_v15 = vand.u32 2147483647, %v1140_v36  ;;  %vm1146_vm5 = vweird.f32 %v1140_v36 }
 0xee8   :  { %v1153_v2 = vor.u32 1.1754944e-38, %v1152_v8  ;;  %vm1151_vm7 = vcmp.eq.f32.partialorder %v1150_v15, 8.507059e+37 }
 0xeec   :  { %v1784_v40 = vpop.eup %1783 }
 0xeed   :  { %v1142_v39 = vmul.f32 %v1784_v40, %v1140_v36  ;;  %vm1147_vm4 = vweird.f32 %v1784_v40 }
 0xeee   :  { %vm1148_vm6 = vmor %vm1146_vm5, %vm1147_vm4 }
 0xeef   :  { %v1143_v38 = vsub.f32 1.0, %v1142_v39 }
 0xef1   :  { %v1144_v21 = vmul.f32 %v1784_v40, %v1143_v38  ;;  %v2605_v38 = vsel %vm2851_vm14, %v2539_v61, %v2536_v14 }
 0xef3   :  { %v1145_v0 = vadd.f32 %v1784_v40, %v1144_v21 }
 0xef5   :  { %v1210_v46 = vpop.f32.mrf.mxu1  ;;  %v1149_v34 = vsel %vm1148_vm6, %v1784_v40, %v1145_v0 }
 0xef6   :  { %v1213_v5 = vadd.f32 %v1680_v49, %v1210_v46  ;;  %v1154_v37 = vsel %vm1151_vm7, %v1153_v2, %v1149_v34 }
 0xef7   :  { %v1156_v1 = vmul.f32 %v1154_v37, %v2110_v17 }
 0xef8   :  { %v1214_v3 = vmul.f32 %v1213_v5, %v2110_v17 }
 0xef9   :  { %v1157_v6 = vsub.f32 %v1156_v1, %v2118_v42 }
 0xefa   :  { %v1682_v13 = vmul.f32 -1.442695, %v1214_v3 }
 0xefb   :  { %1160 = vrot.lane.b32.xlu2 %v1157_v6, %s1934_s27  ;;  %v1158_v8 = vmul.f32 %v1157_v6, %v2605_v38 }
 0xefc   :  { %1785 = vpow2.f32 %v1682_v13 }
 0xf02   :  { %v1786_v43 = vpop.eup %1785 }
 0xf03   :  { %v1218_v12 = vadd.f32 1.0, %v1786_v43 }
 0xf05   :  { %1787 = vrcp.f32 %v1218_v12  ;;  %v1230_v51 = vand.u32 2147483648, %v1218_v12  ;;  %v1228_v60 = vand.u32 2147483647, %v1218_v12  ;;  %vm1224_vm9 = vweird.f32 %v1218_v12 }
 0xf07   :  { %v1231_v54 = vor.u32 1.1754944e-38, %v1230_v51  ;;  %vm1229_vm4 = vcmp.eq.f32.partialorder %v1228_v60, 8.507059e+37 }
 0xf0b   :  { %v1788_v57 = vpop.eup %1787 }
 0xf0c   :  { %v1220_v10 = vmul.f32 %v1788_v57, %v1218_v12  ;;  %vm1225_vm8 = vweird.f32 %v1788_v57 }
 0xf0d   :  { %vm1226_vm10 = vmor %vm1224_vm9, %vm1225_vm8 }
 0xf0e   :  { %v1221_v28 = vsub.f32 1.0, %v1220_v10 }
 0xf10   :  { %v1222_v59 = vmul.f32 %v1788_v57, %v1221_v28 }
 0xf12   :  { %v1223_v53 = vadd.f32 %v1788_v57, %v1222_v59 }
 0xf14   :  { %v1227_v55 = vsel %vm1226_vm10, %v1788_v57, %v1223_v53  ;;  %v1352_v57 = vld [vmem:[%s2839_s2] sm:$0x3]  ;;  %s1939_s2 = smov [#allocation6]  }
 0xf15   :  { %v1232_v30 = vsel %vm1229_vm4, %v1231_v54, %v1227_v55  ;;  %s1545_s4 = sshll.u32 %s1939_s2, 4  ;;  %s1546_s4 = int_to_ptr.vmem [resolvable:$true] %s1545_s4 }
 0xf16   :  { %v1234_v58 = vmul.f32 %v1232_v30, %v2110_v17 }
 0xf18   :  { %v1235_v4 = vsub.f32 %v1234_v58, %v2118_v42 }
 0xf1a   :  { %1238 = vrot.lane.b32.xlu0 %v1235_v4, %s1934_s27 }
 0xf55   :  { %v1161_v16 = vpop.permute.xlu2 %1160 }
 0xf56   :  { %v1163_v36 = vmul.f32 %v1161_v16, %v1157_v6 }
 0xf58   :  { %1165 = vrot.lane.b32.xlu1 %v1163_v36, %s1932_s3 }
 0xf8c   :  { %v1239_v40 = vpop.permute.xlu0 %1238 }
 0xf8d   :  { %v1241_v39 = vmul.f32 %v1239_v40, %v1235_v4 }
 0xf8f   :  { %1243 = vrot.lane.b32.xlu2 %v1241_v39, %s1932_s3 }
 0xf97   :  { %1177 = vperm.xlu2 %1704, %v2244_v24   ;;  %v2617_v24 = vsel %vm1090_vm3, %v2549_v23, %v2546_v25 }
 0xf98   :  { %v1236_v14 = vmul.f32 %v1235_v4, %v2617_v24 }
 0xfca   :  { %v1166_v21 = vpop.permute.xlu1 %1165 }
 0xfcb   :  { %v2608_v15 = vadd.f32 %v1166_v21, %v1158_v8 }
 0xfcd   :  { %1789 = vtanh.f32 %v2608_v15 }
 0xfd3   :  { %v1790_v49 = vpop.eup %1789 }
 0xfd4   :  { %1171 = vrot.lane.b32.xlu0 %v1790_v49, %s1934_s27 }
 0xfdc   :  { %1255 = vperm.xlu0 %1705, %v2216_v32  }
 0xfe9   :  { %v1244_v61 = vpop.permute.xlu2 %1243 }
 0xfea   :  { %v2620_v0 = vadd.f32 %v1244_v61, %v1236_v14 }
 0xfec   :  { %1791 = vtanh.f32 %v2620_v0 }
 0xff1   :  { %v2624_v46 = vpop.permute.xlu2 %1177 }
 0xff2   :  { %v1792_v2 = vpop.eup %1791  ;;  %vm1179_vm5 = vcmp.eq.s32.totalorder %v2624_v46, 1  ;;  %v1470_v46 = vld [vmem:[%s2842_s5 + $0x10] sm:$0xff] }
 0xff3   :  { %1249 = vrot.lane.b32.xlu1 %v1792_v2, %s1934_s27 }
0x1046   :  { %v1172_v34 = vpop.permute.xlu0 %1171 }
0x1047   :  { %v2626_v32 = vmul.f32 %v1172_v34, %v1157_v6  ;;  %v1684_v6 = vld [vmem:[%s2838_s1 + $0xe] sm:$0x3]  ;;  %s1547_s1 = sshll.u32 %s2846_s9, 4  ;;  %s1548_s1 = int_to_ptr.hbm [resolvable:$true] %s1547_s1 }
0x1049   :  { %v2633_v25 = vsel %vm1179_vm5, %v2626_v32, %v2564_v19  ;;  %v1182_v35 = vsel %vm1179_vm5, %v2626_v32, 0.0 }
0x104a   :  { %1278 = vrot.lane.b32.xlu1 %v2633_v25, %s1932_s3 }
0x104e   :  { %v2637_v23 = vpop.permute.xlu0 %1255 }
0x104f   :  { %vm1257_vm3 = vcmp.eq.s32.totalorder %v2637_v23, 1 }
0x1065   :  { %v1250_v26 = vpop.permute.xlu1 %1249 }
0x1066   :  { %v1252_v5 = vmul.f32 %v1250_v26, %v1235_v4 }
0x1068   :  { %v2643_v37 = vsel %vm1257_vm3, %v1252_v5, %v2574_v31  ;;  %v2647_v1 = vsel %vm1257_vm3, %v1252_v5, 0.0 }
0x1069   :  { %1354 = vrot.lane.b32.xlu2 %v2643_v37, %s1932_s3 }
0x10bc   :  { %v1279_v19 = vpop.permute.xlu1 %1278 }
0x10bd   :  { %1685 = vmatmul.msk.f32.vlgmr.msra.gmra.mxu2 %vm97_vm1, %v1279_v19 }
0x10c3   :  { %v1355_v3 = vpop.permute.xlu2 %1354 }
0x10c4   :  { %1688 = vmatmul.msk.f32.vlgmr.msra.gmra.mxu3 %vm97_vm1, %v1355_v3 }
0x1140   :  { %v1299_v13 = vpop.f32.mrf.mxu2 }
0x1141   :  { %v1302_v31 = vadd.f32 %v1684_v6, %v1299_v13 }
0x1143   :  { %v1303_v43 = vmul.f32 %v1302_v31, %v2110_v17 }
0x1145   :  { %v1686_v12 = vmul.f32 -1.442695, %v1303_v43 }
0x1147   :  { %1793 = vpow2.f32 %v1686_v12  ;;  %v1375_v10 = vpop.f32.mrf.mxu3 }
0x1148   :  { %v1378_v28 = vadd.f32 %v1375_v10, %v1352_v57 }
0x114a   :  { %v1379_v51 = vmul.f32 %v1378_v28, %v2110_v17 }
0x114c   :  { %v1689_v59 = vmul.f32 -1.442695, %v1379_v51 }
0x114d   :  { %v1794_v60 = vpop.eup %1793 }
0x114e   :  { %v1307_v53 = vadd.f32 1.0, %v1794_v60  ;;  %1795 = vpow2.f32 %v1689_v59  ;;  %v1180_v60 = vsel %vm1179_vm5, %v2608_v15, %v2605_v38 }
0x1150   :  { %1797 = vrcp.f32 %v1307_v53  ;;  %v1319_v16 = vand.u32 2147483648, %v1307_v53  ;;  %v1317_v40 = vand.u32 2147483647, %v1307_v53  ;;  %vm1313_vm7 = vweird.f32 %v1307_v53 }
0x1152   :  { %v1320_v49 = vor.u32 1.1754944e-38, %v1319_v16  ;;  %vm1318_vm9 = vcmp.eq.f32.partialorder %v1317_v40, 8.507059e+37 }
0x1154   :  { %v1796_v54 = vpop.eup %1795 }
0x1155   :  { %v1383_v55 = vadd.f32 1.0, %v1796_v54 }
0x1156   :  { %v1798_v30 = vpop.eup %1797 }
0x1157   :  { %v1309_v58 = vmul.f32 %v1798_v30, %v1307_v53  ;;  %1799 = vrcp.f32 %v1383_v55  ;;  %vm1314_vm6 = vweird.f32 %v1798_v30  ;;  %v1395_v26 = vand.u32 2147483648, %v1383_v55 }
0x1158   :  { %vm1315_vm8 = vmor %vm1313_vm7, %vm1314_vm6  ;;  %v1393_v19 = vand.u32 2147483647, %v1383_v55  ;;  %vm1389_vm4 = vweird.f32 %v1383_v55 }
0x1159   :  { %v1310_v4 = vsub.f32 1.0, %v1309_v58  ;;  %v1396_v13 = vor.u32 1.1754944e-38, %v1395_v26 }
0x115a   :  { %vm1394_vm6 = vcmp.eq.f32.partialorder %v1393_v19, 8.507059e+37 }
0x115b   :  { %v1311_v36 = vmul.f32 %v1798_v30, %v1310_v4 }
0x115d   :  { %v1800_v39 = vpop.eup %1799  ;;  %v1312_v8 = vadd.f32 %v1798_v30, %v1311_v36  ;;  %v1505_v36 = vld [vmem:[%s2844_s7] sm:$0xff] }
0x115e   :  { %v1385_v21 = vmul.f32 %v1800_v39, %v1383_v55  ;;  %vm1390_vm10 = vweird.f32 %v1800_v39  ;;  %v1258_v55 = vsel %vm1257_vm3, %v2620_v0, %v2617_v24  ;;  %v848_v24 = vsel %vm845_vm11, %v2488_v7, 0.0  ;;  %v1512_v0 = vld [vmem:[%s2844_s7 + $0x38] sm:$0xff]  ;;  %v1507_v7 = vld [vmem:[%s2844_s7 + $0x10] sm:$0xff] }
0x115f   :  { %v1316_v14 = vsel %vm1315_vm8, %v1798_v30, %v1312_v8  ;;  %vm1391_vm14 = vmor %vm1389_vm4, %vm1390_vm10  ;;  %1528 = vmatpush.msrb.mxu1 %v1512_v0  ;;  %vm1480_vm11 = vcmask 523264  }
0x1160   :  { %v1386_v61 = vsub.f32 1.0, %v1385_v21  ;;  %v1321_v2 = vsel %vm1318_vm9, %v1320_v49, %v1316_v14 }
0x1161   :  { %v1323_v34 = vmul.f32 %v1321_v2, %v2110_v17  ;;  %1529 = vmatpush.msrb.mxu1 %v1511_v63  ;;  %v1708_v63 = vld [vmem:[%s2843_s6] ss:$0 sm:$0xff] }
0x1162   :  { %v1387_v5 = vmul.f32 %v1800_v39, %v1386_v61 }
0x1163   :  { %v1324_v3 = vsub.f32 %v1323_v34, %v2118_v42  ;;  %v1468_v34 = vld [vmem:[%s2842_s5] sm:$0xff] }
0x1164   :  { %v1388_v6 = vadd.f32 %v1800_v39, %v1387_v5 }
0x1165   :  { %1327 = vrot.lane.b32.xlu0 %v1324_v3, %s1934_s27 }
0x1166   :  { %v1392_v31 = vsel %vm1391_vm14, %v1800_v39, %v1388_v6 }
0x1167   :  { %v1397_v43 = vsel %vm1394_vm6, %v1396_v13, %v1392_v31 }
0x1168   :  { %v1399_v12 = vmul.f32 %v1397_v43, %v2110_v17  ;;  %v1325_v17 = vmul.f32 %v1324_v3, %v1180_v60 }
0x116a   :  { %v1400_v57 = vsub.f32 %v1399_v12, %v2118_v42 }
0x116c   :  { %1403 = vrot.lane.b32.xlu1 %v1400_v57, %s1934_s27 }
0x11d7   :  { %v1328_v10 = vpop.permute.xlu0 %1327 }
0x11d8   :  { %v1330_v28 = vmul.f32 %v1328_v10, %v1324_v3 }
0x11da   :  { %1332 = vrot.lane.b32.xlu2 %v1330_v28, %s1932_s3 }
0x11de   :  { %v1404_v51 = vpop.permute.xlu1 %1403 }
0x11df   :  { %v1406_v59 = vmul.f32 %v1404_v51, %v1400_v57 }
0x11e1   :  { %1408 = vrot.lane.b32.xlu0 %v1406_v59, %s1932_s3 }
0x11e9   :  { %1344 = vperm.xlu0 %1705, %v2158_v11   ;;  %v1401_v11 = vmul.f32 %v1400_v57, %v1258_v55 }
0x1234   :  { %v1333_v53 = vpop.permute.xlu2 %1332 }
0x1235   :  { %v1335_v42 = vadd.f32 %v1333_v53, %v1325_v17 }
0x1237   :  { %1801 = vtanh.f32 %v1335_v42 }
0x123d   :  { %v1802_v54 = vpop.eup %1801 }
0x123e   :  { %1338 = vrot.lane.b32.xlu1 %v1802_v54, %s1934_s27 }
0x1246   :  { %1420 = vperm.xlu1 %1706, %v2138_v62   ;;  %v347_v62 = vsel %vm344_vm13, %v2249_v44, 0.0  ;;  %v1510_v44 = vld [vmem:[%s2844_s7 + $0x28] sm:$0xff] }
0x1247   :  { %1530 = vmatpush.msrb.mxu1 %v1510_v44 }
0x1253   :  { %v1409_v30 = vpop.permute.xlu0 %1408 }
0x1254   :  { %v1411_v58 = vadd.f32 %v1409_v30, %v1401_v11  ;;  %v1707_v30 = vld [vmem:[%s2845_s8] ss:$0 sm:$0xff]  ;;  %s1940_s8 = smov 2  }
0x1256   :  { %1803 = vtanh.f32 %v1411_v58 }
0x125b   :  { %v1345_v4 = vpop.permute.xlu0 %1344 }
0x125c   :  { %v1804_v38 = vpop.eup %1803  ;;  %vm1346_vm14 = vcmp.eq.s32.totalorder %v1345_v4, 1 }
0x125d   :  { %1414 = vrot.lane.b32.xlu2 %v1804_v38, %s1934_s27  ;;  %v1347_v15 = vsel %vm1346_vm14, %v1335_v42, %v1180_v60 }
0x125e   :  { %1444 = vrot.lane.b32.xlu1 %v1347_v15, %s1936_s30 }
0x1266   :  { %427 = vrot.lane.b32.xlu1 %v347_v62, %s1932_s3 }
0x126e   :  { %598 = vrot.lane.b32.xlu1 %v2355_v33, %s1934_s27  ;;  %v1509_v33 = vld [vmem:[%s2844_s7 + $0x20] sm:$0xff] }
0x126f   :  { %1531 = vmatpush.msrb.mxu1 %v1509_v33 }
0x1271   :  { %1532 = vmatpush.msrb.mxu1 %v1508_v22 }
0x1273   :  { %1533 = vmatpush.msrb.mxu1 %v1507_v7 }
0x1276   :  { %928 = vrot.lane.b32.xlu1 %v848_v24, %s1932_s3 }
0x127e   :  { %1099 = vrot.lane.b32.xlu1 %v2578_v52, %s1934_s27  ;;  %v1506_v52 = vld [vmem:[%s2844_s7 + $0x8] sm:$0xff]  ;;  %s1572_s7 = sshll.u32 %s2848_s11, 4  ;;  %s1573_s7 = int_to_ptr.hbm [resolvable:$true] %s1572_s7 }
0x127f   :  { %1534 = vmatpush.msrb.mxu1 %v1506_v52 }
0x1281   :  { %1535 = vmatpush.msrb.mxu1 %v1505_v36 }
0x12b0   :  { %v1339_v23 = vpop.permute.xlu1 %1338 }
0x12b1   :  { %v1341_v16 = vmul.f32 %v1339_v23, %v1324_v3 }
0x12b3   :  { %v1348_v40 = vsel %vm1346_vm14, %v1341_v16, %v2633_v25  ;;  %v1349_v39 = vsel %vm1346_vm14, %v1341_v16, 0.0  ;;  %v175_v25 = vsel %vm169_vm2, %v2179_v9, 0.0  ;;  %vm268_vm2 = vcmask 517120  }
0x12b4   :  { %1438 = vrot.lane.b32.xlu2 %v1348_v40, %s1932_s3  ;;  %1427 = vrot.lane.b32.xlu1 %v1349_v39, %s1932_s3 }
0x12b7   :  { %v1415_v8 = vpop.permute.xlu2 %1414 }
0x12b8   :  { %v1417_v21 = vmul.f32 %v1415_v8, %v1400_v57  ;;  %v1421_v49 = vpop.permute.xlu1 %1420 }
0x12b9   :  { %vm1422_vm13 = vcmp.eq.s32.totalorder %v1421_v49, 1 }
0x12ba   :  { %v1424_v14 = vsel %vm1422_vm13, %v1417_v21, %v2643_v37  ;;  %v1423_v61 = vsel %vm1422_vm13, %v1411_v58, %v1258_v55  ;;  %v514_v37 = vsel %vm511_vm12, %v2334_v48, 0.0  ;;  %vm2852_vm12 = vcmp.eq.s32.totalorder %v2555_v29, 1  ;;  %v1472_v29 = vld [vmem:[%s2842_s5 + $0x20] sm:$0xff] }
0x12bb   :  { %1461 = vrot.lane.b32.xlu0 %v1424_v14, %s1934_s27  ;;  %v1425_v48 = vsel %vm1422_vm13, %v1417_v21, 0.0 }
0x12bc   :  { %260 = vrot.lane.b32.xlu2 %v175_v25, %s1932_s3  ;;  %1454 = vrot.lane.b32.xlu1 %v1423_v61, %s1936_s30  ;;  %s1570_s30 = sshll.u32 %s1938_s10, 4  ;;  %s1571_s30 = int_to_ptr.vmem [resolvable:$true] %s1570_s30 }
0x12c3   :  { %264 = vrot.lane.b32.xlu0 %v2175_v27, %s1934_s27 }
0x12c4   :  { %431 = vrot.lane.b32.xlu2 %v2270_v50, %s1934_s27  ;;  %v1015_v50 = vsel %vm2852_vm12, %v2557_v41, 0.0  ;;  %v1471_v41 = vld [vmem:[%s2842_s5 + $0x18] sm:$0xff] }
0x12cb   :  { %594 = vrot.lane.b32.xlu0 %v514_v37, %s1932_s3 }
0x12cc   :  { %761 = vrot.lane.b32.xlu2 %v681_v20, %s1932_s3 }
0x12d0   :  { %v1445_v9 = vpop.permute.xlu1 %1444 }
0x12d1   :  { %1447 = vst.msk [vmem:[#allocation3] sm:$0x3] %vm66_vm0, %v1445_v9  ;;  %v1465_v27 = vsel %vm97_vm1, %v1445_v9, %v1423_v61 }
0x12d2   :  { %1467 = vst.msk [vmem:[#allocation10] sm:$0x3] %vm268_vm2, %v1465_v27  ;;  %1691 = vmatmul.msk.f32.vlgmr.msrb.gmra.mxu1 %vm1480_vm11, %v1465_v27 }
0x12d3   :  { %765 = vrot.lane.b32.xlu0 %v2440_v47, %s1934_s27  ;;  %v1474_v47 = vld [vmem:[%s2842_s5 + $0x30] sm:$0xff] }
0x12d4   :  { %932 = vrot.lane.b32.xlu2 %v2509_v45, %s1934_s27  ;;  %v1473_v45 = vld [vmem:[%s2842_s5 + $0x28] sm:$0xff]  ;;  %1493 = vmatpush.msrb.mxu0 %v1474_v47 }
0x12d6   :  { %1494 = vmatpush.msrb.mxu0 %v1473_v45 }
0x12d8   :  { %v428_v56 = vpop.permute.xlu1 %427  ;;  %1495 = vmatpush.msrb.mxu0 %v1472_v29 }
0x12da   :  { %1496 = vmatpush.msrb.mxu0 %v1471_v41 }
0x12db   :  { %1095 = vrot.lane.b32.xlu0 %v1015_v50, %s1932_s3 }
0x12dc   :  { %1262 = vrot.lane.b32.xlu2 %v1182_v35, %s1932_s3  ;;  %1497 = vmatpush.msrb.mxu0 %v1470_v46 }
0x12e0   :  { %v599_v32 = vpop.permute.xlu1 %598 }
0x12e3   :  { %1266 = vrot.lane.b32.xlu0 %v2647_v1, %s1934_s27  ;;  %v1469_v1 = vld [vmem:[%s2842_s5 + $0x8] sm:$0xff] }
0x12e4   :  { %1431 = vrot.lane.b32.xlu2 %v1425_v48, %s1934_s27  ;;  %1498 = vmatpush.msrb.mxu0 %v1469_v1 }
0x12e6   :  { %1499 = vmatpush.msrb.mxu0 %v1468_v34 }
0x12e8   :  { %v929_v26 = vpop.permute.xlu1 %928 }
0x12eb   :  { %1449 = vrot.lane.b32.xlu0 %v1424_v14, %s1932_s3 }
0x12f0   :  { %v1100_v19 = vpop.permute.xlu1 %1099 }
0x130e   :  { %v1439_v2 = vpop.permute.xlu2 %1438 }
0x130f   :  { %1442 = vst.msk [vmem:[#allocation2] sm:$0x3] %vm66_vm0, %v1439_v2 }
0x1316   :  { %v261_v5 = vpop.permute.xlu2 %260 }
0x131e   :  { %v432_v3 = vpop.permute.xlu2 %431 }
0x131f   :  { %v434_v6 = vsel %vm97_vm1, %v428_v56, %v432_v3 }
0x1320   :  { %436 = vst.msk [vmem:[#allocation6 + $0x2] sm:$0x3] %vm268_vm2, %v434_v6 }
0x1326   :  { %v762_v13 = vpop.permute.xlu2 %761  ;;  %v1428_v31 = vpop.permute.xlu1 %1427 }
0x132d   :  { %v1462_v43 = vpop.permute.xlu0 %1461 }
0x132e   :  { %v1464_v12 = vsel %vm97_vm1, %v1439_v2, %v1462_v43  ;;  %v933_v57 = vpop.permute.xlu2 %932  ;;  %v1455_v10 = vpop.permute.xlu1 %1454 }
0x132f   :  { %1466 = vst.msk [vmem:[#allocation8] sm:$0x3] %vm268_vm2, %v1464_v12  ;;  %v935_v28 = vsel %vm97_vm1, %v929_v26, %v933_v57  ;;  %1690 = vmatmul.msk.f32.vlgmr.msrb.gmra.mxu0 %vm1480_vm11, %v1464_v12 }
0x1330   :  { %937 = vst.msk [vmem:[#allocation6 + $0x8] sm:$0x3] %vm268_vm2, %v935_v28  ;;  %1564 = dma.vmem_to_hbm [thread:$0]  %s1560_s18, 32, %s1562_s16, [#allocation9]  }
0x1331   :  { %1457 = vst.msk [vmem:[#allocation5] sm:$0x3] %vm66_vm0, %v1455_v10  ;;  %1575 = dma.vmem_to_hbm [thread:$0]  %s1571_s30, 32, %s1573_s7, [#allocation9]  }
0x1332   :  { %s1594_s16 = sshll.u32 %s2850_s13, 4  ;;  %s1595_s16 = int_to_ptr.hbm [resolvable:$true] %s1594_s16 }
0x1335   :  { %v265_v51 = vpop.permute.xlu0 %264 }
0x1336   :  { %v267_v59 = vsel %vm97_vm1, %v261_v5, %v265_v51  ;;  %v1263_v60 = vpop.permute.xlu2 %1262 }
0x1337   :  { %269 = vst.msk [vmem:[#allocation6] sm:$0x3] %vm268_vm2, %v267_v59 }
0x133d   :  { %v595_v17 = vpop.permute.xlu0 %594 }
0x133e   :  { %v601_v53 = vsel %vm97_vm1, %v595_v17, %v599_v32  ;;  %v1432_v42 = vpop.permute.xlu2 %1431 }
0x133f   :  { %603 = vst.msk [vmem:[#allocation6 + $0x4] sm:$0x3] %vm268_vm2, %v601_v53  ;;  %v1434_v54 = vsel %vm97_vm1, %v1428_v31, %v1432_v42 }
0x1340   :  { %1436 = vst.msk [vmem:[#allocation6 + $0xe] sm:$0x3] %vm268_vm2, %v1434_v54 }
0x1345   :  { %v766_v55 = vpop.permute.xlu0 %765 }
0x1346   :  { %v768_v11 = vsel %vm97_vm1, %v762_v13, %v766_v55 }
0x1347   :  { %770 = vst.msk [vmem:[#allocation6 + $0x6] sm:$0x3] %vm268_vm2, %v768_v11 }
0x134d   :  { %v1096_v58 = vpop.permute.xlu0 %1095 }
0x134e   :  { %v1102_v4 = vsel %vm97_vm1, %v1096_v58, %v1100_v19 }
0x134f   :  { %1104 = vst.msk [vmem:[#allocation6 + $0xa] sm:$0x3] %vm268_vm2, %v1102_v4  ;;  %v1537_v38 = vpop.f32.mrf.mxu1 }
0x1350   :  { %v1538_v15 = vadd.f32 %v1707_v30, %v1537_v38 }
0x1352   :  { %1540 = vst.msk [vmem:[#allocation13] sm:$0x3] %vm66_vm0, %v1538_v15 }
0x1355   :  { %v1267_v62 = vpop.permute.xlu0 %1266 }
0x1356   :  { %v1269_v24 = vsel %vm97_vm1, %v1263_v60, %v1267_v62 }
0x1357   :  { %1271 = vst.msk [vmem:[#allocation6 + $0xc] sm:$0x3] %vm268_vm2, %v1269_v24 }
0x1358   :  { %1553 = dma.vmem_to_hbm [thread:$0]  %s1546_s4, 256, %s1548_s1, [#allocation7], %s1932_s3, %s1932_s3, %s1940_s8  }
0x135d   :  { %v1450_v0 = vpop.permute.xlu0 %1449 }
0x135e   :  { %1452 = vst.msk [vmem:[#allocation4] sm:$0x3] %vm66_vm0, %v1450_v0 }
0x13ac   :  { %v1501_v44 = vpop.f32.mrf.mxu0 }
0x13ad   :  { %v1502_v33 = vadd.f32 %v1708_v63, %v1501_v44 }
0x13af   :  { %1504 = vst.msk [vmem:[#allocation11] sm:$0x3] %vm66_vm0, %v1502_v33 }
0x13b0   :  { %1586 = dma.vmem_to_hbm [thread:$0]  %s1582_s25, 32, %s1584_s29, [#allocation12]  }
0x13b1   :  { %1597 = dma.vmem_to_hbm [thread:$0]  %s1593_s14, 32, %s1595_s16, [#allocation12]  }
0x13b2   :  { %1925 = dma.done.wait [#allocation7], 256  }
0x13b3   :  { %1926 = vsyncadd [#allocation7], 4294967040 }
0x13b4   :  { %1927 = dma.done.wait [#allocation9], 64  }
0x13b5   :  { %1928 = vsyncadd [#allocation9], 4294967232 }
0x13b6   :  { %1929 = dma.done.wait [#allocation12], 64  }
0x13b7   :  { %1930 = vsyncadd [#allocation12], 4294967232 }
0x13b8   :  { %1618 = vsyncpa [#allocation7], 1 }
0x13b9   :  { %1619 = vsyncpa [#allocation9], 1 }
0x13ba   :  { %1620 = vsyncpa [#allocation12], 1 }

</bundles_post_ra>
